<compile_context>
chip_gen: v6e
topology: v6e:2x2x1
jax: 0.10.0
libtpu: 0.0.40
codegen_flags: <defaults>
</compile_context>

<pallas_src>
import jax
import jax.numpy as jnp
from jax.experimental import pallas as pl
from jax.experimental.pallas import tpu as pltpu


def tlstm_kernel(xp_ref, ws_ref, bs_ref, out_ref, hc_ref):
    """One grid step == one chunk of T time steps of the recurrence.

    xp_ref : (b, T, 5H)  hoisted U_all(x)+biases in cols [0:4H], timestamps
                         broadcast to H lanes in cols [4H:5H]
    ws_ref : (2H, 5H)    stacked recurrent weight [[W_all^T, 0], [0, W_d^T]]
    bs_ref : (1, 5H)     stacked bias (zeros for gate cols, W_d bias in tail)
    out_ref: (b, T, H)   hidden states for this chunk
    hc_ref : (b, 2H)     persistent VMEM state [h | c] carried across chunks
    """
    T = xp_ref.shape[1]
    H = out_ref.shape[-1]

    @pl.when(pl.program_id(0) == 0)
    def _init():
        hc_ref[...] = jnp.zeros_like(hc_ref)

    w_s = ws_ref[...]          # (2H, 5H)
    b_s = bs_ref[...]          # (1, 5H)

    # T is small by construction (<= 32): fully unroll with static indices.
    for tt in range(T):
        hc = hc_ref[...]                          # (b, 2H) = [h | c]
        c = hc[:, H:2 * H]
        xp = xp_ref[:, tt, :]                     # (b, 5H)

        # One fused MXU call: gates pre-act in cols [0:4H], W_d(c)+b_d in tail.
        fused = jnp.dot(hc, w_s, preferred_element_type=jnp.float32) + b_s

        gates = fused[:, :4 * H] + xp[:, :4 * H]  # W_all h + U_all x + biases
        c_s1 = jnp.tanh(fused[:, 4 * H:])         # tanh(W_d c + b_d)
        t = xp[:, 4 * H:]                         # timestamp, broadcast to H
        c_adj = (c - c_s1) + c_s1 * t             # c_l + c_s2

        # torch.chunk order: f, i, o, c_tmp (all sigmoid, as in the module).
        f = jax.nn.sigmoid(gates[:, 0 * H:1 * H])
        i = jax.nn.sigmoid(gates[:, 1 * H:2 * H])
        o = jax.nn.sigmoid(gates[:, 2 * H:3 * H])
        c_tmp = jax.nn.sigmoid(gates[:, 3 * H:4 * H])

        c_new = f * c_adj + i * c_tmp
        h_new = o * jnp.tanh(c_new)

        hc_ref[:, 0 * H:1 * H] = h_new
        hc_ref[:, 1 * H:2 * H] = c_new
        out_ref[:, tt, :] = h_new


def time_lstm_forward(inputs, timestamps, params, reverse=False):
    """Pallas wrapper.  inputs: (b, seq, E), timestamps: (b, seq)."""
    b, seq, e = inputs.shape
    H = params["W_d_w"].shape[0]
    f32 = jnp.float32

    inputs = inputs.astype(f32)
    timestamps = timestamps.astype(f32)

    # --- Hoist the input projection out of the recurrence (one big matmul),
    #     folding BOTH gate biases into it.
    gate_bias = (params["W_all_b"] + params["U_all_b"]).astype(f32)           # (4H,)
    xp = jnp.einsum("bse,ge->bsg", inputs,
                    params["U_all_w"].astype(f32)) + gate_bias                 # (b,seq,4H)

    # --- Append broadcast timestamps as H extra lanes -> one lane-dense input.
    t_cols = jnp.broadcast_to(timestamps[:, :, None], (b, seq, H)).astype(f32)
    xp_aug = jnp.concatenate([xp, t_cols], axis=-1)                            # (b,seq,5H)

    # --- Fuse the recurrent matmuls: [h | c] @ W_s, W_s = [[W_all^T,0],[0,W_d^T]].
    w_s = jnp.zeros((2 * H, 5 * H), f32)
    w_s = w_s.at[:H, :4 * H].set(params["W_all_w"].astype(f32).T)
    w_s = w_s.at[H:, 4 * H:].set(params["W_d_w"].astype(f32).T)
    b_s = jnp.concatenate([jnp.zeros((4 * H,), f32),
                           params["W_d_b"].astype(f32)])[None, :]              # (1,5H)

    # --- Chunk the sequence: each grid step runs T time steps, fully unrolled.
    MAX_CHUNK = 32
    if seq <= MAX_CHUNK:
        T, seq_p = seq, seq
    else:
        T = MAX_CHUNK
        seq_p = ((seq + T - 1) // T) * T
        # Trailing zero-padded steps never influence earlier outputs.
        xp_aug = jnp.pad(xp_aug, ((0, 0), (0, seq_p - seq), (0, 0)))

    grid_spec = pltpu.PrefetchScalarGridSpec(
        num_scalar_prefetch=0,
        grid=(seq_p // T,),
        in_specs=[
            pl.BlockSpec((b, T, 5 * H), lambda s: (0, s, 0)),   # hoisted proj + t
            pl.BlockSpec((2 * H, 5 * H), lambda s: (0, 0)),     # fused weight
            pl.BlockSpec((1, 5 * H), lambda s: (0, 0)),         # fused bias
        ],
        out_specs=pl.BlockSpec((b, T, H), lambda s: (0, s, 0)),
        scratch_shapes=[
            pltpu.VMEM((b, 2 * H), f32),    # persistent [h | c] state
        ],
    )

    out = pl.pallas_call(
        tlstm_kernel,
        grid_spec=grid_spec,
        out_shape=jax.ShapeDtypeStruct((b, seq_p, H), f32),
        compiler_params=pltpu.CompilerParams(
            dimension_semantics=("arbitrary",)),   # serial recurrence over chunks
    )(xp_aug, w_s, b_s)

    out = out[:, :seq, :]
    if reverse:
        # PyTorch forward only reverses the stacked output list.
        out = out[:, ::-1, :]
    return out


def time_lstm_ref(inputs, timestamps, params, reverse=False):
    """Pure-JAX reference mirroring the PyTorch forward exactly."""
    b, seq, e = inputs.shape
    H = params["W_d_w"].shape[0]
    h = jnp.zeros((b, H), jnp.float32)
    c = jnp.zeros((b, H), jnp.float32)
    outs = []
    for s in range(seq):
        c_s1 = jnp.tanh(c @ params["W_d_w"].T + params["W_d_b"])
        c_s2 = c_s1 * timestamps[:, s:s + 1]
        c_adj = (c - c_s1) + c_s2
        pre = (h @ params["W_all_w"].T + params["W_all_b"]
               + inputs[:, s] @ params["U_all_w"].T + params["U_all_b"])
        f = jax.nn.sigmoid(pre[:, 0 * H:1 * H])
        i = jax.nn.sigmoid(pre[:, 1 * H:2 * H])
        o = jax.nn.sigmoid(pre[:, 2 * H:3 * H])
        c_tmp = jax.nn.sigmoid(pre[:, 3 * H:4 * H])
        c = f * c_adj + i * c_tmp
        h = o * jnp.tanh(c)
        outs.append(h)
    if reverse:
        outs = outs[::-1]
    return jnp.stack(outs, axis=1)


def init_params(key, input_size, hidden_size):
    """Deterministic synthetic init mimicking nn.Linear default ranges."""
    ks = jax.random.split(key, 6)

    def unif(k, shape, fan_in):
        bound = 1.0 / jnp.sqrt(fan_in)
        return jax.random.uniform(k, shape, jnp.float32, -bound, bound)

    return {
        "W_all_w": unif(ks[0], (4 * hidden_size, hidden_size), hidden_size),
        "W_all_b": unif(ks[1], (4 * hidden_size,), hidden_size),
        "U_all_w": unif(ks[2], (4 * hidden_size, input_size), input_size),
        "U_all_b": unif(ks[3], (4 * hidden_size,), input_size),
        "W_d_w":   unif(ks[4], (hidden_size, hidden_size), hidden_size),
        "W_d_b":   unif(ks[5], (hidden_size,), hidden_size),
    }


if __name__ == "__main__":
    B, SEQ, INPUT_SIZE, HIDDEN = 2, 8, 16, 32

    key = jax.random.PRNGKey(0)
    k_x, k_t, k_p = jax.random.split(key, 3)

    inputs = jax.random.normal(k_x, (B, SEQ, INPUT_SIZE), jnp.float32)
    timestamps = jax.random.uniform(k_t, (B, SEQ), jnp.float32, 0.0, 1.0)
    params = init_params(k_p, INPUT_SIZE, HIDDEN)

    fwd = jax.jit(time_lstm_forward, static_argnames=("reverse",))
    out = fwd(inputs, timestamps, params)
    out = jax.block_until_ready(out)

    ref = time_lstm_ref(inputs, timestamps, params)
    assert out.shape == (B, SEQ, HIDDEN), out.shape
    assert jnp.allclose(out, ref, atol=1e-5, rtol=1e-5), \
        float(jnp.max(jnp.abs(out - ref)))

    print("KERNEL_OK")
</pallas_src>

<mosaic_0001>
module attributes {stable_mosaic.version = 11 : i64} {
  func.func @tlstm_kernel(%arg0: i32, %arg1: memref<2x8x160xf32, #tpu.memory_space<vmem>>, %arg2: memref<64x160xf32, #tpu.memory_space<vmem>>, %arg3: memref<1x160xf32, #tpu.memory_space<vmem>>, %arg4: memref<2x8x32xf32, #tpu.memory_space<vmem>>, %arg5: memref<2x64xf32, #tpu.memory_space<vmem>>) attributes {dimension_semantics = [#tpu.dimension_semantics<arbitrary>], iteration_bounds = array<i64: 1>, scalar_prefetch = 0 : i64, scratch_operands = 1 : i64, tpu.core_type = #tpu.core_type<tc>, window_params = [{transform_indices = @transform_0, window_bounds = array<i64: 2, 8, 160>}, {pipeline_mode = #tpu.pipeline_mode<synchronous>, transform_indices = @transform_1, window_bounds = array<i64: 64, 160>}, {pipeline_mode = #tpu.pipeline_mode<synchronous>, transform_indices = @transform_2, window_bounds = array<i64: 1, 160>}, {transform_indices = @transform_3, window_bounds = array<i64: 2, 8, 32>}]} {
    %c0_i32 = arith.constant 0 : i32
    %0 = arith.cmpi eq, %arg0, %c0_i32 : i32
    %1 = arith.extui %0 : i1 to i32
    %c0_i32_0 = arith.constant 0 : i32
    %2 = arith.cmpi ne, %1, %c0_i32_0 : i32
    scf.if %2 {
      %cst_131 = arith.constant 0.000000e+00 : f32
      %405 = vector.broadcast %cst_131 : f32 to vector<2x64xf32>
      %c0_132 = arith.constant 0 : index
      %c0_133 = arith.constant 0 : index
      %406 = vector.load %arg5[%c0_132, %c0_133] : memref<2x64xf32, #tpu.memory_space<vmem>>, vector<2x64xf32>
      tpu.vector_store %arg5[%c0_132, %c0_133], %405 {strides = array<i32>} : memref<2x64xf32, #tpu.memory_space<vmem>>, vector<2x64xf32>,
    } else {
    }
    %c0 = arith.constant 0 : index
    %c0_1 = arith.constant 0 : index
    %3 = vector.load %arg2[%c0, %c0_1] : memref<64x160xf32, #tpu.memory_space<vmem>>, vector<64x160xf32>
    %c0_2 = arith.constant 0 : index
    %c0_3 = arith.constant 0 : index
    %4 = vector.load %arg3[%c0_2, %c0_3] : memref<1x160xf32, #tpu.memory_space<vmem>>, vector<1x160xf32>
    %c0_4 = arith.constant 0 : index
    %c0_5 = arith.constant 0 : index
    %5 = vector.load %arg5[%c0_4, %c0_5] : memref<2x64xf32, #tpu.memory_space<vmem>>, vector<2x64xf32>
    %6 = vector.extract_strided_slice %5 {offsets = [0, 32], sizes = [2, 32], strides = [1, 1]} : vector<2x64xf32> to vector<2x32xf32>
    %c0_6 = arith.constant 0 : index
    %c0_7 = arith.constant 0 : index
    %c0_8 = arith.constant 0 : index
    %7 = vector.load %arg1[%c0_6, %c0_7, %c0_8] : memref<2x8x160xf32, #tpu.memory_space<vmem>>, vector<2x1x160xf32>
    %8 = vector.shape_cast %7 : vector<2x1x160xf32> to vector<2x160xf32>
    %cst = arith.constant dense<0.000000e+00> : vector<2x160xf32>
    %9 = tpu.matmul %5, %3, %cst {dimension_numbers = #tpu.dot_dimension_numbers<[1], [0], [0], [1], [0, 0, 1, 1], [], []>} : vector<2x64xf32>, vector<64x160xf32>, vector<2x160xf32> -> vector<2x160xf32>
    %10 = vector.broadcast %4 : vector<1x160xf32> to vector<2x160xf32>
    %11 = arith.addf %9, %10 : vector<2x160xf32>
    %12 = vector.extract_strided_slice %11 {offsets = [0, 0], sizes = [2, 128], strides = [1, 1]} : vector<2x160xf32> to vector<2x128xf32>
    %13 = vector.extract_strided_slice %8 {offsets = [0, 0], sizes = [2, 128], strides = [1, 1]} : vector<2x160xf32> to vector<2x128xf32>
    %14 = arith.addf %12, %13 : vector<2x128xf32>
    %15 = vector.extract_strided_slice %11 {offsets = [0, 128], sizes = [2, 32], strides = [1, 1]} : vector<2x160xf32> to vector<2x32xf32>
    %16 = math.tanh %15 : vector<2x32xf32>
    %17 = vector.extract_strided_slice %8 {offsets = [0, 128], sizes = [2, 32], strides = [1, 1]} : vector<2x160xf32> to vector<2x32xf32>
    %18 = arith.subf %6, %16 : vector<2x32xf32>
    %19 = arith.mulf %16, %17 : vector<2x32xf32>
    %20 = arith.addf %18, %19 : vector<2x32xf32>
    %21 = vector.extract_strided_slice %14 {offsets = [0, 0], sizes = [2, 32], strides = [1, 1]} : vector<2x128xf32> to vector<2x32xf32>
    %22 = arith.negf %21 : vector<2x32xf32>
    %23 = math.exp %22 : vector<2x32xf32>
    %cst_9 = arith.constant 1.000000e+00 : f32
    %24 = vector.broadcast %cst_9 : f32 to vector<2x32xf32>
    %25 = arith.addf %24, %23 : vector<2x32xf32>
    %26 = arith.divf %24, %25 : vector<2x32xf32>
    %27 = vector.extract_strided_slice %14 {offsets = [0, 32], sizes = [2, 32], strides = [1, 1]} : vector<2x128xf32> to vector<2x32xf32>
    %28 = arith.negf %27 : vector<2x32xf32>
    %29 = math.exp %28 : vector<2x32xf32>
    %cst_10 = arith.constant 1.000000e+00 : f32
    %30 = vector.broadcast %cst_10 : f32 to vector<2x32xf32>
    %31 = arith.addf %30, %29 : vector<2x32xf32>
    %32 = arith.divf %30, %31 : vector<2x32xf32>
    %33 = vector.extract_strided_slice %14 {offsets = [0, 64], sizes = [2, 32], strides = [1, 1]} : vector<2x128xf32> to vector<2x32xf32>
    %34 = arith.negf %33 : vector<2x32xf32>
    %35 = math.exp %34 : vector<2x32xf32>
    %cst_11 = arith.constant 1.000000e+00 : f32
    %36 = vector.broadcast %cst_11 : f32 to vector<2x32xf32>
    %37 = arith.addf %36, %35 : vector<2x32xf32>
    %38 = arith.divf %36, %37 : vector<2x32xf32>
    %39 = vector.extract_strided_slice %14 {offsets = [0, 96], sizes = [2, 32], strides = [1, 1]} : vector<2x128xf32> to vector<2x32xf32>
    %40 = arith.negf %39 : vector<2x32xf32>
    %41 = math.exp %40 : vector<2x32xf32>
    %cst_12 = arith.constant 1.000000e+00 : f32
    %42 = vector.broadcast %cst_12 : f32 to vector<2x32xf32>
    %43 = arith.addf %42, %41 : vector<2x32xf32>
    %44 = arith.divf %42, %43 : vector<2x32xf32>
    %45 = arith.mulf %26, %20 : vector<2x32xf32>
    %46 = arith.mulf %32, %44 : vector<2x32xf32>
    %47 = arith.addf %45, %46 : vector<2x32xf32>
    %48 = math.tanh %47 : vector<2x32xf32>
    %49 = arith.mulf %38, %48 : vector<2x32xf32>
    %c0_13 = arith.constant 0 : index
    %c0_14 = arith.constant 0 : index
    %50 = vector.load %arg5[%c0_13, %c0_14] : memref<2x64xf32, #tpu.memory_space<vmem>>, vector<2x32xf32>
    tpu.vector_store %arg5[%c0_13, %c0_14], %49 {strides = array<i32>} : memref<2x64xf32, #tpu.memory_space<vmem>>, vector<2x32xf32>,
    %c0_15 = arith.constant 0 : index
    %c32 = arith.constant 32 : index
    %51 = vector.load %arg5[%c0_15, %c32] : memref<2x64xf32, #tpu.memory_space<vmem>>, vector<2x32xf32>
    tpu.vector_store %arg5[%c0_15, %c32], %47 {strides = array<i32>} : memref<2x64xf32, #tpu.memory_space<vmem>>, vector<2x32xf32>,
    %c0_16 = arith.constant 0 : index
    %c0_17 = arith.constant 0 : index
    %c0_18 = arith.constant 0 : index
    %52 = vector.load %arg4[%c0_16, %c0_17, %c0_18] : memref<2x8x32xf32, #tpu.memory_space<vmem>>, vector<2x1x32xf32>
    %53 = vector.shape_cast %52 : vector<2x1x32xf32> to vector<2x32xf32>
    %54 = vector.shape_cast %49 : vector<2x32xf32> to vector<2x1x32xf32>
    tpu.vector_store %arg4[%c0_16, %c0_17, %c0_18], %54 {strides = array<i32>} : memref<2x8x32xf32, #tpu.memory_space<vmem>>, vector<2x1x32xf32>,
    %c0_19 = arith.constant 0 : index
    %c0_20 = arith.constant 0 : index
    %55 = vector.load %arg5[%c0_19, %c0_20] : memref<2x64xf32, #tpu.memory_space<vmem>>, vector<2x64xf32>
    %56 = vector.extract_strided_slice %55 {offsets = [0, 32], sizes = [2, 32], strides = [1, 1]} : vector<2x64xf32> to vector<2x32xf32>
    %c0_21 = arith.constant 0 : index
    %c1 = arith.constant 1 : index
    %c0_22 = arith.constant 0 : index
    %57 = vector.load %arg1[%c0_21, %c1, %c0_22] : memref<2x8x160xf32, #tpu.memory_space<vmem>>, vector<2x1x160xf32>
    %58 = vector.shape_cast %57 : vector<2x1x160xf32> to vector<2x160xf32>
    %cst_23 = arith.constant dense<0.000000e+00> : vector<2x160xf32>
    %59 = tpu.matmul %55, %3, %cst_23 {dimension_numbers = #tpu.dot_dimension_numbers<[1], [0], [0], [1], [0, 0, 1, 1], [], []>} : vector<2x64xf32>, vector<64x160xf32>, vector<2x160xf32> -> vector<2x160xf32>
    %60 = vector.broadcast %4 : vector<1x160xf32> to vector<2x160xf32>
    %61 = arith.addf %59, %60 : vector<2x160xf32>
    %62 = vector.extract_strided_slice %61 {offsets = [0, 0], sizes = [2, 128], strides = [1, 1]} : vector<2x160xf32> to vector<2x128xf32>
    %63 = vector.extract_strided_slice %58 {offsets = [0, 0], sizes = [2, 128], strides = [1, 1]} : vector<2x160xf32> to vector<2x128xf32>
    %64 = arith.addf %62, %63 : vector<2x128xf32>
    %65 = vector.extract_strided_slice %61 {offsets = [0, 128], sizes = [2, 32], strides = [1, 1]} : vector<2x160xf32> to vector<2x32xf32>
    %66 = math.tanh %65 : vector<2x32xf32>
    %67 = vector.extract_strided_slice %58 {offsets = [0, 128], sizes = [2, 32], strides = [1, 1]} : vector<2x160xf32> to vector<2x32xf32>
    %68 = arith.subf %56, %66 : vector<2x32xf32>
    %69 = arith.mulf %66, %67 : vector<2x32xf32>
    %70 = arith.addf %68, %69 : vector<2x32xf32>
    %71 = vector.extract_strided_slice %64 {offsets = [0, 0], sizes = [2, 32], strides = [1, 1]} : vector<2x128xf32> to vector<2x32xf32>
    %72 = arith.negf %71 : vector<2x32xf32>
    %73 = math.exp %72 : vector<2x32xf32>
    %cst_24 = arith.constant 1.000000e+00 : f32
    %74 = vector.broadcast %cst_24 : f32 to vector<2x32xf32>
    %75 = arith.addf %74, %73 : vector<2x32xf32>
    %76 = arith.divf %74, %75 : vector<2x32xf32>
    %77 = vector.extract_strided_slice %64 {offsets = [0, 32], sizes = [2, 32], strides = [1, 1]} : vector<2x128xf32> to vector<2x32xf32>
    %78 = arith.negf %77 : vector<2x32xf32>
    %79 = math.exp %78 : vector<2x32xf32>
    %cst_25 = arith.constant 1.000000e+00 : f32
    %80 = vector.broadcast %cst_25 : f32 to vector<2x32xf32>
    %81 = arith.addf %80, %79 : vector<2x32xf32>
    %82 = arith.divf %80, %81 : vector<2x32xf32>
    %83 = vector.extract_strided_slice %64 {offsets = [0, 64], sizes = [2, 32], strides = [1, 1]} : vector<2x128xf32> to vector<2x32xf32>
    %84 = arith.negf %83 : vector<2x32xf32>
    %85 = math.exp %84 : vector<2x32xf32>
    %cst_26 = arith.constant 1.000000e+00 : f32
    %86 = vector.broadcast %cst_26 : f32 to vector<2x32xf32>
    %87 = arith.addf %86, %85 : vector<2x32xf32>
    %88 = arith.divf %86, %87 : vector<2x32xf32>
    %89 = vector.extract_strided_slice %64 {offsets = [0, 96], sizes = [2, 32], strides = [1, 1]} : vector<2x128xf32> to vector<2x32xf32>
    %90 = arith.negf %89 : vector<2x32xf32>
    %91 = math.exp %90 : vector<2x32xf32>
    %cst_27 = arith.constant 1.000000e+00 : f32
    %92 = vector.broadcast %cst_27 : f32 to vector<2x32xf32>
    %93 = arith.addf %92, %91 : vector<2x32xf32>
    %94 = arith.divf %92, %93 : vector<2x32xf32>
    %95 = arith.mulf %76, %70 : vector<2x32xf32>
    %96 = arith.mulf %82, %94 : vector<2x32xf32>
    %97 = arith.addf %95, %96 : vector<2x32xf32>
    %98 = math.tanh %97 : vector<2x32xf32>
    %99 = arith.mulf %88, %98 : vector<2x32xf32>
    %c0_28 = arith.constant 0 : index
    %c0_29 = arith.constant 0 : index
    %100 = vector.load %arg5[%c0_28, %c0_29] : memref<2x64xf32, #tpu.memory_space<vmem>>, vector<2x32xf32>
    tpu.vector_store %arg5[%c0_28, %c0_29], %99 {strides = array<i32>} : memref<2x64xf32, #tpu.memory_space<vmem>>, vector<2x32xf32>,
    %c0_30 = arith.constant 0 : index
    %c32_31 = arith.constant 32 : index
    %101 = vector.load %arg5[%c0_30, %c32_31] : memref<2x64xf32, #tpu.memory_space<vmem>>, vector<2x32xf32>
    tpu.vector_store %arg5[%c0_30, %c32_31], %97 {strides = array<i32>} : memref<2x64xf32, #tpu.memory_space<vmem>>, vector<2x32xf32>,
    %c0_32 = arith.constant 0 : index
    %c1_33 = arith.constant 1 : index
    %c0_34 = arith.constant 0 : index
    %102 = vector.load %arg4[%c0_32, %c1_33, %c0_34] : memref<2x8x32xf32, #tpu.memory_space<vmem>>, vector<2x1x32xf32>
    %103 = vector.shape_cast %102 : vector<2x1x32xf32> to vector<2x32xf32>
    %104 = vector.shape_cast %99 : vector<2x32xf32> to vector<2x1x32xf32>
    tpu.vector_store %arg4[%c0_32, %c1_33, %c0_34], %104 {strides = array<i32>} : memref<2x8x32xf32, #tpu.memory_space<vmem>>, vector<2x1x32xf32>,
    %c0_35 = arith.constant 0 : index
    %c0_36 = arith.constant 0 : index
    %105 = vector.load %arg5[%c0_35, %c0_36] : memref<2x64xf32, #tpu.memory_space<vmem>>, vector<2x64xf32>
    %106 = vector.extract_strided_slice %105 {offsets = [0, 32], sizes = [2, 32], strides = [1, 1]} : vector<2x64xf32> to vector<2x32xf32>
    %c0_37 = arith.constant 0 : index
    %c2 = arith.constant 2 : index
    %c0_38 = arith.constant 0 : index
    %107 = vector.load %arg1[%c0_37, %c2, %c0_38] : memref<2x8x160xf32, #tpu.memory_space<vmem>>, vector<2x1x160xf32>
    %108 = vector.shape_cast %107 : vector<2x1x160xf32> to vector<2x160xf32>
    %cst_39 = arith.constant dense<0.000000e+00> : vector<2x160xf32>
    %109 = tpu.matmul %105, %3, %cst_39 {dimension_numbers = #tpu.dot_dimension_numbers<[1], [0], [0], [1], [0, 0, 1, 1], [], []>} : vector<2x64xf32>, vector<64x160xf32>, vector<2x160xf32> -> vector<2x160xf32>
    %110 = vector.broadcast %4 : vector<1x160xf32> to vector<2x160xf32>
    %111 = arith.addf %109, %110 : vector<2x160xf32>
    %112 = vector.extract_strided_slice %111 {offsets = [0, 0], sizes = [2, 128], strides = [1, 1]} : vector<2x160xf32> to vector<2x128xf32>
    %113 = vector.extract_strided_slice %108 {offsets = [0, 0], sizes = [2, 128], strides = [1, 1]} : vector<2x160xf32> to vector<2x128xf32>
    %114 = arith.addf %112, %113 : vector<2x128xf32>
    %115 = vector.extract_strided_slice %111 {offsets = [0, 128], sizes = [2, 32], strides = [1, 1]} : vector<2x160xf32> to vector<2x32xf32>
    %116 = math.tanh %115 : vector<2x32xf32>
    %117 = vector.extract_strided_slice %108 {offsets = [0, 128], sizes = [2, 32], strides = [1, 1]} : vector<2x160xf32> to vector<2x32xf32>
    %118 = arith.subf %106, %116 : vector<2x32xf32>
    %119 = arith.mulf %116, %117 : vector<2x32xf32>
    %120 = arith.addf %118, %119 : vector<2x32xf32>
    %121 = vector.extract_strided_slice %114 {offsets = [0, 0], sizes = [2, 32], strides = [1, 1]} : vector<2x128xf32> to vector<2x32xf32>
    %122 = arith.negf %121 : vector<2x32xf32>
    %123 = math.exp %122 : vector<2x32xf32>
    %cst_40 = arith.constant 1.000000e+00 : f32
    %124 = vector.broadcast %cst_40 : f32 to vector<2x32xf32>
    %125 = arith.addf %124, %123 : vector<2x32xf32>
    %126 = arith.divf %124, %125 : vector<2x32xf32>
    %127 = vector.extract_strided_slice %114 {offsets = [0, 32], sizes = [2, 32], strides = [1, 1]} : vector<2x128xf32> to vector<2x32xf32>
    %128 = arith.negf %127 : vector<2x32xf32>
    %129 = math.exp %128 : vector<2x32xf32>
    %cst_41 = arith.constant 1.000000e+00 : f32
    %130 = vector.broadcast %cst_41 : f32 to vector<2x32xf32>
    %131 = arith.addf %130, %129 : vector<2x32xf32>
    %132 = arith.divf %130, %131 : vector<2x32xf32>
    %133 = vector.extract_strided_slice %114 {offsets = [0, 64], sizes = [2, 32], strides = [1, 1]} : vector<2x128xf32> to vector<2x32xf32>
    %134 = arith.negf %133 : vector<2x32xf32>
    %135 = math.exp %134 : vector<2x32xf32>
    %cst_42 = arith.constant 1.000000e+00 : f32
    %136 = vector.broadcast %cst_42 : f32 to vector<2x32xf32>
    %137 = arith.addf %136, %135 : vector<2x32xf32>
    %138 = arith.divf %136, %137 : vector<2x32xf32>
    %139 = vector.extract_strided_slice %114 {offsets = [0, 96], sizes = [2, 32], strides = [1, 1]} : vector<2x128xf32> to vector<2x32xf32>
    %140 = arith.negf %139 : vector<2x32xf32>
    %141 = math.exp %140 : vector<2x32xf32>
    %cst_43 = arith.constant 1.000000e+00 : f32
    %142 = vector.broadcast %cst_43 : f32 to vector<2x32xf32>
    %143 = arith.addf %142, %141 : vector<2x32xf32>
    %144 = arith.divf %142, %143 : vector<2x32xf32>
    %145 = arith.mulf %126, %120 : vector<2x32xf32>
    %146 = arith.mulf %132, %144 : vector<2x32xf32>
    %147 = arith.addf %145, %146 : vector<2x32xf32>
    %148 = math.tanh %147 : vector<2x32xf32>
    %149 = arith.mulf %138, %148 : vector<2x32xf32>
    %c0_44 = arith.constant 0 : index
    %c0_45 = arith.constant 0 : index
    %150 = vector.load %arg5[%c0_44, %c0_45] : memref<2x64xf32, #tpu.memory_space<vmem>>, vector<2x32xf32>
    tpu.vector_store %arg5[%c0_44, %c0_45], %149 {strides = array<i32>} : memref<2x64xf32, #tpu.memory_space<vmem>>, vector<2x32xf32>,
    %c0_46 = arith.constant 0 : index
    %c32_47 = arith.constant 32 : index
    %151 = vector.load %arg5[%c0_46, %c32_47] : memref<2x64xf32, #tpu.memory_space<vmem>>, vector<2x32xf32>
    tpu.vector_store %arg5[%c0_46, %c32_47], %147 {strides = array<i32>} : memref<2x64xf32, #tpu.memory_space<vmem>>, vector<2x32xf32>,
    %c0_48 = arith.constant 0 : index
    %c2_49 = arith.constant 2 : index
    %c0_50 = arith.constant 0 : index
    %152 = vector.load %arg4[%c0_48, %c2_49, %c0_50] : memref<2x8x32xf32, #tpu.memory_space<vmem>>, vector<2x1x32xf32>
    %153 = vector.shape_cast %152 : vector<2x1x32xf32> to vector<2x32xf32>
    %154 = vector.shape_cast %149 : vector<2x32xf32> to vector<2x1x32xf32>
    tpu.vector_store %arg4[%c0_48, %c2_49, %c0_50], %154 {strides = array<i32>} : memref<2x8x32xf32, #tpu.memory_space<vmem>>, vector<2x1x32xf32>,
    %c0_51 = arith.constant 0 : index
    %c0_52 = arith.constant 0 : index
    %155 = vector.load %arg5[%c0_51, %c0_52] : memref<2x64xf32, #tpu.memory_space<vmem>>, vector<2x64xf32>
    %156 = vector.extract_strided_slice %155 {offsets = [0, 32], sizes = [2, 32], strides = [1, 1]} : vector<2x64xf32> to vector<2x32xf32>
    %c0_53 = arith.constant 0 : index
    %c3 = arith.constant 3 : index
    %c0_54 = arith.constant 0 : index
    %157 = vector.load %arg1[%c0_53, %c3, %c0_54] : memref<2x8x160xf32, #tpu.memory_space<vmem>>, vector<2x1x160xf32>
    %158 = vector.shape_cast %157 : vector<2x1x160xf32> to vector<2x160xf32>
    %cst_55 = arith.constant dense<0.000000e+00> : vector<2x160xf32>
    %159 = tpu.matmul %155, %3, %cst_55 {dimension_numbers = #tpu.dot_dimension_numbers<[1], [0], [0], [1], [0, 0, 1, 1], [], []>} : vector<2x64xf32>, vector<64x160xf32>, vector<2x160xf32> -> vector<2x160xf32>
    %160 = vector.broadcast %4 : vector<1x160xf32> to vector<2x160xf32>
    %161 = arith.addf %159, %160 : vector<2x160xf32>
    %162 = vector.extract_strided_slice %161 {offsets = [0, 0], sizes = [2, 128], strides = [1, 1]} : vector<2x160xf32> to vector<2x128xf32>
    %163 = vector.extract_strided_slice %158 {offsets = [0, 0], sizes = [2, 128], strides = [1, 1]} : vector<2x160xf32> to vector<2x128xf32>
    %164 = arith.addf %162, %163 : vector<2x128xf32>
    %165 = vector.extract_strided_slice %161 {offsets = [0, 128], sizes = [2, 32], strides = [1, 1]} : vector<2x160xf32> to vector<2x32xf32>
    %166 = math.tanh %165 : vector<2x32xf32>
    %167 = vector.extract_strided_slice %158 {offsets = [0, 128], sizes = [2, 32], strides = [1, 1]} : vector<2x160xf32> to vector<2x32xf32>
    %168 = arith.subf %156, %166 : vector<2x32xf32>
    %169 = arith.mulf %166, %167 : vector<2x32xf32>
    %170 = arith.addf %168, %169 : vector<2x32xf32>
    %171 = vector.extract_strided_slice %164 {offsets = [0, 0], sizes = [2, 32], strides = [1, 1]} : vector<2x128xf32> to vector<2x32xf32>
    %172 = arith.negf %171 : vector<2x32xf32>
    %173 = math.exp %172 : vector<2x32xf32>
    %cst_56 = arith.constant 1.000000e+00 : f32
    %174 = vector.broadcast %cst_56 : f32 to vector<2x32xf32>
    %175 = arith.addf %174, %173 : vector<2x32xf32>
    %176 = arith.divf %174, %175 : vector<2x32xf32>
    %177 = vector.extract_strided_slice %164 {offsets = [0, 32], sizes = [2, 32], strides = [1, 1]} : vector<2x128xf32> to vector<2x32xf32>
    %178 = arith.negf %177 : vector<2x32xf32>
    %179 = math.exp %178 : vector<2x32xf32>
    %cst_57 = arith.constant 1.000000e+00 : f32
    %180 = vector.broadcast %cst_57 : f32 to vector<2x32xf32>
    %181 = arith.addf %180, %179 : vector<2x32xf32>
    %182 = arith.divf %180, %181 : vector<2x32xf32>
    %183 = vector.extract_strided_slice %164 {offsets = [0, 64], sizes = [2, 32], strides = [1, 1]} : vector<2x128xf32> to vector<2x32xf32>
    %184 = arith.negf %183 : vector<2x32xf32>
    %185 = math.exp %184 : vector<2x32xf32>
    %cst_58 = arith.constant 1.000000e+00 : f32
    %186 = vector.broadcast %cst_58 : f32 to vector<2x32xf32>
    %187 = arith.addf %186, %185 : vector<2x32xf32>
    %188 = arith.divf %186, %187 : vector<2x32xf32>
    %189 = vector.extract_strided_slice %164 {offsets = [0, 96], sizes = [2, 32], strides = [1, 1]} : vector<2x128xf32> to vector<2x32xf32>
    %190 = arith.negf %189 : vector<2x32xf32>
    %191 = math.exp %190 : vector<2x32xf32>
    %cst_59 = arith.constant 1.000000e+00 : f32
    %192 = vector.broadcast %cst_59 : f32 to vector<2x32xf32>
    %193 = arith.addf %192, %191 : vector<2x32xf32>
    %194 = arith.divf %192, %193 : vector<2x32xf32>
    %195 = arith.mulf %176, %170 : vector<2x32xf32>
    %196 = arith.mulf %182, %194 : vector<2x32xf32>
    %197 = arith.addf %195, %196 : vector<2x32xf32>
    %198 = math.tanh %197 : vector<2x32xf32>
    %199 = arith.mulf %188, %198 : vector<2x32xf32>
    %c0_60 = arith.constant 0 : index
    %c0_61 = arith.constant 0 : index
    %200 = vector.load %arg5[%c0_60, %c0_61] : memref<2x64xf32, #tpu.memory_space<vmem>>, vector<2x32xf32>
    tpu.vector_store %arg5[%c0_60, %c0_61], %199 {strides = array<i32>} : memref<2x64xf32, #tpu.memory_space<vmem>>, vector<2x32xf32>,
    %c0_62 = arith.constant 0 : index
    %c32_63 = arith.constant 32 : index
    %201 = vector.load %arg5[%c0_62, %c32_63] : memref<2x64xf32, #tpu.memory_space<vmem>>, vector<2x32xf32>
    tpu.vector_store %arg5[%c0_62, %c32_63], %197 {strides = array<i32>} : memref<2x64xf32, #tpu.memory_space<vmem>>, vector<2x32xf32>,
    %c0_64 = arith.constant 0 : index
    %c3_65 = arith.constant 3 : index
    %c0_66 = arith.constant 0 : index
    %202 = vector.load %arg4[%c0_64, %c3_65, %c0_66] : memref<2x8x32xf32, #tpu.memory_space<vmem>>, vector<2x1x32xf32>
    %203 = vector.shape_cast %202 : vector<2x1x32xf32> to vector<2x32xf32>
    %204 = vector.shape_cast %199 : vector<2x32xf32> to vector<2x1x32xf32>
    tpu.vector_store %arg4[%c0_64, %c3_65, %c0_66], %204 {strides = array<i32>} : memref<2x8x32xf32, #tpu.memory_space<vmem>>, vector<2x1x32xf32>,
    %c0_67 = arith.constant 0 : index
    %c0_68 = arith.constant 0 : index
    %205 = vector.load %arg5[%c0_67, %c0_68] : memref<2x64xf32, #tpu.memory_space<vmem>>, vector<2x64xf32>
    %206 = vector.extract_strided_slice %205 {offsets = [0, 32], sizes = [2, 32], strides = [1, 1]} : vector<2x64xf32> to vector<2x32xf32>
    %c0_69 = arith.constant 0 : index
    %c4 = arith.constant 4 : index
    %c0_70 = arith.constant 0 : index
    %207 = vector.load %arg1[%c0_69, %c4, %c0_70] : memref<2x8x160xf32, #tpu.memory_space<vmem>>, vector<2x1x160xf32>
    %208 = vector.shape_cast %207 : vector<2x1x160xf32> to vector<2x160xf32>
    %cst_71 = arith.constant dense<0.000000e+00> : vector<2x160xf32>
    %209 = tpu.matmul %205, %3, %cst_71 {dimension_numbers = #tpu.dot_dimension_numbers<[1], [0], [0], [1], [0, 0, 1, 1], [], []>} : vector<2x64xf32>, vector<64x160xf32>, vector<2x160xf32> -> vector<2x160xf32>
    %210 = vector.broadcast %4 : vector<1x160xf32> to vector<2x160xf32>
    %211 = arith.addf %209, %210 : vector<2x160xf32>
    %212 = vector.extract_strided_slice %211 {offsets = [0, 0], sizes = [2, 128], strides = [1, 1]} : vector<2x160xf32> to vector<2x128xf32>
    %213 = vector.extract_strided_slice %208 {offsets = [0, 0], sizes = [2, 128], strides = [1, 1]} : vector<2x160xf32> to vector<2x128xf32>
    %214 = arith.addf %212, %213 : vector<2x128xf32>
    %215 = vector.extract_strided_slice %211 {offsets = [0, 128], sizes = [2, 32], strides = [1, 1]} : vector<2x160xf32> to vector<2x32xf32>
    %216 = math.tanh %215 : vector<2x32xf32>
    %217 = vector.extract_strided_slice %208 {offsets = [0, 128], sizes = [2, 32], strides = [1, 1]} : vector<2x160xf32> to vector<2x32xf32>
    %218 = arith.subf %206, %216 : vector<2x32xf32>
    %219 = arith.mulf %216, %217 : vector<2x32xf32>
    %220 = arith.addf %218, %219 : vector<2x32xf32>
    %221 = vector.extract_strided_slice %214 {offsets = [0, 0], sizes = [2, 32], strides = [1, 1]} : vector<2x128xf32> to vector<2x32xf32>
    %222 = arith.negf %221 : vector<2x32xf32>
    %223 = math.exp %222 : vector<2x32xf32>
    %cst_72 = arith.constant 1.000000e+00 : f32
    %224 = vector.broadcast %cst_72 : f32 to vector<2x32xf32>
    %225 = arith.addf %224, %223 : vector<2x32xf32>
    %226 = arith.divf %224, %225 : vector<2x32xf32>
    %227 = vector.extract_strided_slice %214 {offsets = [0, 32], sizes = [2, 32], strides = [1, 1]} : vector<2x128xf32> to vector<2x32xf32>
    %228 = arith.negf %227 : vector<2x32xf32>
    %229 = math.exp %228 : vector<2x32xf32>
    %cst_73 = arith.constant 1.000000e+00 : f32
    %230 = vector.broadcast %cst_73 : f32 to vector<2x32xf32>
    %231 = arith.addf %230, %229 : vector<2x32xf32>
    %232 = arith.divf %230, %231 : vector<2x32xf32>
    %233 = vector.extract_strided_slice %214 {offsets = [0, 64], sizes = [2, 32], strides = [1, 1]} : vector<2x128xf32> to vector<2x32xf32>
    %234 = arith.negf %233 : vector<2x32xf32>
    %235 = math.exp %234 : vector<2x32xf32>
    %cst_74 = arith.constant 1.000000e+00 : f32
    %236 = vector.broadcast %cst_74 : f32 to vector<2x32xf32>
    %237 = arith.addf %236, %235 : vector<2x32xf32>
    %238 = arith.divf %236, %237 : vector<2x32xf32>
    %239 = vector.extract_strided_slice %214 {offsets = [0, 96], sizes = [2, 32], strides = [1, 1]} : vector<2x128xf32> to vector<2x32xf32>
    %240 = arith.negf %239 : vector<2x32xf32>
    %241 = math.exp %240 : vector<2x32xf32>
    %cst_75 = arith.constant 1.000000e+00 : f32
    %242 = vector.broadcast %cst_75 : f32 to vector<2x32xf32>
    %243 = arith.addf %242, %241 : vector<2x32xf32>
    %244 = arith.divf %242, %243 : vector<2x32xf32>
    %245 = arith.mulf %226, %220 : vector<2x32xf32>
    %246 = arith.mulf %232, %244 : vector<2x32xf32>
    %247 = arith.addf %245, %246 : vector<2x32xf32>
    %248 = math.tanh %247 : vector<2x32xf32>
    %249 = arith.mulf %238, %248 : vector<2x32xf32>
    %c0_76 = arith.constant 0 : index
    %c0_77 = arith.constant 0 : index
    %250 = vector.load %arg5[%c0_76, %c0_77] : memref<2x64xf32, #tpu.memory_space<vmem>>, vector<2x32xf32>
    tpu.vector_store %arg5[%c0_76, %c0_77], %249 {strides = array<i32>} : memref<2x64xf32, #tpu.memory_space<vmem>>, vector<2x32xf32>,
    %c0_78 = arith.constant 0 : index
    %c32_79 = arith.constant 32 : index
    %251 = vector.load %arg5[%c0_78, %c32_79] : memref<2x64xf32, #tpu.memory_space<vmem>>, vector<2x32xf32>
    tpu.vector_store %arg5[%c0_78, %c32_79], %247 {strides = array<i32>} : memref<2x64xf32, #tpu.memory_space<vmem>>, vector<2x32xf32>,
    %c0_80 = arith.constant 0 : index
    %c4_81 = arith.constant 4 : index
    %c0_82 = arith.constant 0 : index
    %252 = vector.load %arg4[%c0_80, %c4_81, %c0_82] : memref<2x8x32xf32, #tpu.memory_space<vmem>>, vector<2x1x32xf32>
    %253 = vector.shape_cast %252 : vector<2x1x32xf32> to vector<2x32xf32>
    %254 = vector.shape_cast %249 : vector<2x32xf32> to vector<2x1x32xf32>
    tpu.vector_store %arg4[%c0_80, %c4_81, %c0_82], %254 {strides = array<i32>} : memref<2x8x32xf32, #tpu.memory_space<vmem>>, vector<2x1x32xf32>,
    %c0_83 = arith.constant 0 : index
    %c0_84 = arith.constant 0 : index
    %255 = vector.load %arg5[%c0_83, %c0_84] : memref<2x64xf32, #tpu.memory_space<vmem>>, vector<2x64xf32>
    %256 = vector.extract_strided_slice %255 {offsets = [0, 32], sizes = [2, 32], strides = [1, 1]} : vector<2x64xf32> to vector<2x32xf32>
    %c0_85 = arith.constant 0 : index
    %c5 = arith.constant 5 : index
    %c0_86 = arith.constant 0 : index
    %257 = vector.load %arg1[%c0_85, %c5, %c0_86] : memref<2x8x160xf32, #tpu.memory_space<vmem>>, vector<2x1x160xf32>
    %258 = vector.shape_cast %257 : vector<2x1x160xf32> to vector<2x160xf32>
    %cst_87 = arith.constant dense<0.000000e+00> : vector<2x160xf32>
    %259 = tpu.matmul %255, %3, %cst_87 {dimension_numbers = #tpu.dot_dimension_numbers<[1], [0], [0], [1], [0, 0, 1, 1], [], []>} : vector<2x64xf32>, vector<64x160xf32>, vector<2x160xf32> -> vector<2x160xf32>
    %260 = vector.broadcast %4 : vector<1x160xf32> to vector<2x160xf32>
    %261 = arith.addf %259, %260 : vector<2x160xf32>
    %262 = vector.extract_strided_slice %261 {offsets = [0, 0], sizes = [2, 128], strides = [1, 1]} : vector<2x160xf32> to vector<2x128xf32>
    %263 = vector.extract_strided_slice %258 {offsets = [0, 0], sizes = [2, 128], strides = [1, 1]} : vector<2x160xf32> to vector<2x128xf32>
    %264 = arith.addf %262, %263 : vector<2x128xf32>
    %265 = vector.extract_strided_slice %261 {offsets = [0, 128], sizes = [2, 32], strides = [1, 1]} : vector<2x160xf32> to vector<2x32xf32>
    %266 = math.tanh %265 : vector<2x32xf32>
    %267 = vector.extract_strided_slice %258 {offsets = [0, 128], sizes = [2, 32], strides = [1, 1]} : vector<2x160xf32> to vector<2x32xf32>
    %268 = arith.subf %256, %266 : vector<2x32xf32>
    %269 = arith.mulf %266, %267 : vector<2x32xf32>
    %270 = arith.addf %268, %269 : vector<2x32xf32>
    %271 = vector.extract_strided_slice %264 {offsets = [0, 0], sizes = [2, 32], strides = [1, 1]} : vector<2x128xf32> to vector<2x32xf32>
    %272 = arith.negf %271 : vector<2x32xf32>
    %273 = math.exp %272 : vector<2x32xf32>
    %cst_88 = arith.constant 1.000000e+00 : f32
    %274 = vector.broadcast %cst_88 : f32 to vector<2x32xf32>
    %275 = arith.addf %274, %273 : vector<2x32xf32>
    %276 = arith.divf %274, %275 : vector<2x32xf32>
    %277 = vector.extract_strided_slice %264 {offsets = [0, 32], sizes = [2, 32], strides = [1, 1]} : vector<2x128xf32> to vector<2x32xf32>
    %278 = arith.negf %277 : vector<2x32xf32>
    %279 = math.exp %278 : vector<2x32xf32>
    %cst_89 = arith.constant 1.000000e+00 : f32
    %280 = vector.broadcast %cst_89 : f32 to vector<2x32xf32>
    %281 = arith.addf %280, %279 : vector<2x32xf32>
    %282 = arith.divf %280, %281 : vector<2x32xf32>
    %283 = vector.extract_strided_slice %264 {offsets = [0, 64], sizes = [2, 32], strides = [1, 1]} : vector<2x128xf32> to vector<2x32xf32>
    %284 = arith.negf %283 : vector<2x32xf32>
    %285 = math.exp %284 : vector<2x32xf32>
    %cst_90 = arith.constant 1.000000e+00 : f32
    %286 = vector.broadcast %cst_90 : f32 to vector<2x32xf32>
    %287 = arith.addf %286, %285 : vector<2x32xf32>
    %288 = arith.divf %286, %287 : vector<2x32xf32>
    %289 = vector.extract_strided_slice %264 {offsets = [0, 96], sizes = [2, 32], strides = [1, 1]} : vector<2x128xf32> to vector<2x32xf32>
    %290 = arith.negf %289 : vector<2x32xf32>
    %291 = math.exp %290 : vector<2x32xf32>
    %cst_91 = arith.constant 1.000000e+00 : f32
    %292 = vector.broadcast %cst_91 : f32 to vector<2x32xf32>
    %293 = arith.addf %292, %291 : vector<2x32xf32>
    %294 = arith.divf %292, %293 : vector<2x32xf32>
    %295 = arith.mulf %276, %270 : vector<2x32xf32>
    %296 = arith.mulf %282, %294 : vector<2x32xf32>
    %297 = arith.addf %295, %296 : vector<2x32xf32>
    %298 = math.tanh %297 : vector<2x32xf32>
    %299 = arith.mulf %288, %298 : vector<2x32xf32>
    %c0_92 = arith.constant 0 : index
    %c0_93 = arith.constant 0 : index
    %300 = vector.load %arg5[%c0_92, %c0_93] : memref<2x64xf32, #tpu.memory_space<vmem>>, vector<2x32xf32>
    tpu.vector_store %arg5[%c0_92, %c0_93], %299 {strides = array<i32>} : memref<2x64xf32, #tpu.memory_space<vmem>>, vector<2x32xf32>,
    %c0_94 = arith.constant 0 : index
    %c32_95 = arith.constant 32 : index
    %301 = vector.load %arg5[%c0_94, %c32_95] : memref<2x64xf32, #tpu.memory_space<vmem>>, vector<2x32xf32>
    tpu.vector_store %arg5[%c0_94, %c32_95], %297 {strides = array<i32>} : memref<2x64xf32, #tpu.memory_space<vmem>>, vector<2x32xf32>,
    %c0_96 = arith.constant 0 : index
    %c5_97 = arith.constant 5 : index
    %c0_98 = arith.constant 0 : index
    %302 = vector.load %arg4[%c0_96, %c5_97, %c0_98] : memref<2x8x32xf32, #tpu.memory_space<vmem>>, vector<2x1x32xf32>
    %303 = vector.shape_cast %302 : vector<2x1x32xf32> to vector<2x32xf32>
    %304 = vector.shape_cast %299 : vector<2x32xf32> to vector<2x1x32xf32>
    tpu.vector_store %arg4[%c0_96, %c5_97, %c0_98], %304 {strides = array<i32>} : memref<2x8x32xf32, #tpu.memory_space<vmem>>, vector<2x1x32xf32>,
    %c0_99 = arith.constant 0 : index
    %c0_100 = arith.constant 0 : index
    %305 = vector.load %arg5[%c0_99, %c0_100] : memref<2x64xf32, #tpu.memory_space<vmem>>, vector<2x64xf32>
    %306 = vector.extract_strided_slice %305 {offsets = [0, 32], sizes = [2, 32], strides = [1, 1]} : vector<2x64xf32> to vector<2x32xf32>
    %c0_101 = arith.constant 0 : index
    %c6 = arith.constant 6 : index
    %c0_102 = arith.constant 0 : index
    %307 = vector.load %arg1[%c0_101, %c6, %c0_102] : memref<2x8x160xf32, #tpu.memory_space<vmem>>, vector<2x1x160xf32>
    %308 = vector.shape_cast %307 : vector<2x1x160xf32> to vector<2x160xf32>
    %cst_103 = arith.constant dense<0.000000e+00> : vector<2x160xf32>
    %309 = tpu.matmul %305, %3, %cst_103 {dimension_numbers = #tpu.dot_dimension_numbers<[1], [0], [0], [1], [0, 0, 1, 1], [], []>} : vector<2x64xf32>, vector<64x160xf32>, vector<2x160xf32> -> vector<2x160xf32>
    %310 = vector.broadcast %4 : vector<1x160xf32> to vector<2x160xf32>
    %311 = arith.addf %309, %310 : vector<2x160xf32>
    %312 = vector.extract_strided_slice %311 {offsets = [0, 0], sizes = [2, 128], strides = [1, 1]} : vector<2x160xf32> to vector<2x128xf32>
    %313 = vector.extract_strided_slice %308 {offsets = [0, 0], sizes = [2, 128], strides = [1, 1]} : vector<2x160xf32> to vector<2x128xf32>
    %314 = arith.addf %312, %313 : vector<2x128xf32>
    %315 = vector.extract_strided_slice %311 {offsets = [0, 128], sizes = [2, 32], strides = [1, 1]} : vector<2x160xf32> to vector<2x32xf32>
    %316 = math.tanh %315 : vector<2x32xf32>
    %317 = vector.extract_strided_slice %308 {offsets = [0, 128], sizes = [2, 32], strides = [1, 1]} : vector<2x160xf32> to vector<2x32xf32>
    %318 = arith.subf %306, %316 : vector<2x32xf32>
    %319 = arith.mulf %316, %317 : vector<2x32xf32>
    %320 = arith.addf %318, %319 : vector<2x32xf32>
    %321 = vector.extract_strided_slice %314 {offsets = [0, 0], sizes = [2, 32], strides = [1, 1]} : vector<2x128xf32> to vector<2x32xf32>
    %322 = arith.negf %321 : vector<2x32xf32>
    %323 = math.exp %322 : vector<2x32xf32>
    %cst_104 = arith.constant 1.000000e+00 : f32
    %324 = vector.broadcast %cst_104 : f32 to vector<2x32xf32>
    %325 = arith.addf %324, %323 : vector<2x32xf32>
    %326 = arith.divf %324, %325 : vector<2x32xf32>
    %327 = vector.extract_strided_slice %314 {offsets = [0, 32], sizes = [2, 32], strides = [1, 1]} : vector<2x128xf32> to vector<2x32xf32>
    %328 = arith.negf %327 : vector<2x32xf32>
    %329 = math.exp %328 : vector<2x32xf32>
    %cst_105 = arith.constant 1.000000e+00 : f32
    %330 = vector.broadcast %cst_105 : f32 to vector<2x32xf32>
    %331 = arith.addf %330, %329 : vector<2x32xf32>
    %332 = arith.divf %330, %331 : vector<2x32xf32>
    %333 = vector.extract_strided_slice %314 {offsets = [0, 64], sizes = [2, 32], strides = [1, 1]} : vector<2x128xf32> to vector<2x32xf32>
    %334 = arith.negf %333 : vector<2x32xf32>
    %335 = math.exp %334 : vector<2x32xf32>
    %cst_106 = arith.constant 1.000000e+00 : f32
    %336 = vector.broadcast %cst_106 : f32 to vector<2x32xf32>
    %337 = arith.addf %336, %335 : vector<2x32xf32>
    %338 = arith.divf %336, %337 : vector<2x32xf32>
    %339 = vector.extract_strided_slice %314 {offsets = [0, 96], sizes = [2, 32], strides = [1, 1]} : vector<2x128xf32> to vector<2x32xf32>
    %340 = arith.negf %339 : vector<2x32xf32>
    %341 = math.exp %340 : vector<2x32xf32>
    %cst_107 = arith.constant 1.000000e+00 : f32
    %342 = vector.broadcast %cst_107 : f32 to vector<2x32xf32>
    %343 = arith.addf %342, %341 : vector<2x32xf32>
    %344 = arith.divf %342, %343 : vector<2x32xf32>
    %345 = arith.mulf %326, %320 : vector<2x32xf32>
    %346 = arith.mulf %332, %344 : vector<2x32xf32>
    %347 = arith.addf %345, %346 : vector<2x32xf32>
    %348 = math.tanh %347 : vector<2x32xf32>
    %349 = arith.mulf %338, %348 : vector<2x32xf32>
    %c0_108 = arith.constant 0 : index
    %c0_109 = arith.constant 0 : index
    %350 = vector.load %arg5[%c0_108, %c0_109] : memref<2x64xf32, #tpu.memory_space<vmem>>, vector<2x32xf32>
    tpu.vector_store %arg5[%c0_108, %c0_109], %349 {strides = array<i32>} : memref<2x64xf32, #tpu.memory_space<vmem>>, vector<2x32xf32>,
    %c0_110 = arith.constant 0 : index
    %c32_111 = arith.constant 32 : index
    %351 = vector.load %arg5[%c0_110, %c32_111] : memref<2x64xf32, #tpu.memory_space<vmem>>, vector<2x32xf32>
    tpu.vector_store %arg5[%c0_110, %c32_111], %347 {strides = array<i32>} : memref<2x64xf32, #tpu.memory_space<vmem>>, vector<2x32xf32>,
    %c0_112 = arith.constant 0 : index
    %c6_113 = arith.constant 6 : index
    %c0_114 = arith.constant 0 : index
    %352 = vector.load %arg4[%c0_112, %c6_113, %c0_114] : memref<2x8x32xf32, #tpu.memory_space<vmem>>, vector<2x1x32xf32>
    %353 = vector.shape_cast %352 : vector<2x1x32xf32> to vector<2x32xf32>
    %354 = vector.shape_cast %349 : vector<2x32xf32> to vector<2x1x32xf32>
    tpu.vector_store %arg4[%c0_112, %c6_113, %c0_114], %354 {strides = array<i32>} : memref<2x8x32xf32, #tpu.memory_space<vmem>>, vector<2x1x32xf32>,
    %c0_115 = arith.constant 0 : index
    %c0_116 = arith.constant 0 : index
    %355 = vector.load %arg5[%c0_115, %c0_116] : memref<2x64xf32, #tpu.memory_space<vmem>>, vector<2x64xf32>
    %356 = vector.extract_strided_slice %355 {offsets = [0, 32], sizes = [2, 32], strides = [1, 1]} : vector<2x64xf32> to vector<2x32xf32>
    %c0_117 = arith.constant 0 : index
    %c7 = arith.constant 7 : index
    %c0_118 = arith.constant 0 : index
    %357 = vector.load %arg1[%c0_117, %c7, %c0_118] : memref<2x8x160xf32, #tpu.memory_space<vmem>>, vector<2x1x160xf32>
    %358 = vector.shape_cast %357 : vector<2x1x160xf32> to vector<2x160xf32>
    %cst_119 = arith.constant dense<0.000000e+00> : vector<2x160xf32>
    %359 = tpu.matmul %355, %3, %cst_119 {dimension_numbers = #tpu.dot_dimension_numbers<[1], [0], [0], [1], [0, 0, 1, 1], [], []>} : vector<2x64xf32>, vector<64x160xf32>, vector<2x160xf32> -> vector<2x160xf32>
    %360 = vector.broadcast %4 : vector<1x160xf32> to vector<2x160xf32>
    %361 = arith.addf %359, %360 : vector<2x160xf32>
    %362 = vector.extract_strided_slice %361 {offsets = [0, 0], sizes = [2, 128], strides = [1, 1]} : vector<2x160xf32> to vector<2x128xf32>
    %363 = vector.extract_strided_slice %358 {offsets = [0, 0], sizes = [2, 128], strides = [1, 1]} : vector<2x160xf32> to vector<2x128xf32>
    %364 = arith.addf %362, %363 : vector<2x128xf32>
    %365 = vector.extract_strided_slice %361 {offsets = [0, 128], sizes = [2, 32], strides = [1, 1]} : vector<2x160xf32> to vector<2x32xf32>
    %366 = math.tanh %365 : vector<2x32xf32>
    %367 = vector.extract_strided_slice %358 {offsets = [0, 128], sizes = [2, 32], strides = [1, 1]} : vector<2x160xf32> to vector<2x32xf32>
    %368 = arith.subf %356, %366 : vector<2x32xf32>
    %369 = arith.mulf %366, %367 : vector<2x32xf32>
    %370 = arith.addf %368, %369 : vector<2x32xf32>
    %371 = vector.extract_strided_slice %364 {offsets = [0, 0], sizes = [2, 32], strides = [1, 1]} : vector<2x128xf32> to vector<2x32xf32>
    %372 = arith.negf %371 : vector<2x32xf32>
    %373 = math.exp %372 : vector<2x32xf32>
    %cst_120 = arith.constant 1.000000e+00 : f32
    %374 = vector.broadcast %cst_120 : f32 to vector<2x32xf32>
    %375 = arith.addf %374, %373 : vector<2x32xf32>
    %376 = arith.divf %374, %375 : vector<2x32xf32>
    %377 = vector.extract_strided_slice %364 {offsets = [0, 32], sizes = [2, 32], strides = [1, 1]} : vector<2x128xf32> to vector<2x32xf32>
    %378 = arith.negf %377 : vector<2x32xf32>
    %379 = math.exp %378 : vector<2x32xf32>
    %cst_121 = arith.constant 1.000000e+00 : f32
    %380 = vector.broadcast %cst_121 : f32 to vector<2x32xf32>
    %381 = arith.addf %380, %379 : vector<2x32xf32>
    %382 = arith.divf %380, %381 : vector<2x32xf32>
    %383 = vector.extract_strided_slice %364 {offsets = [0, 64], sizes = [2, 32], strides = [1, 1]} : vector<2x128xf32> to vector<2x32xf32>
    %384 = arith.negf %383 : vector<2x32xf32>
    %385 = math.exp %384 : vector<2x32xf32>
    %cst_122 = arith.constant 1.000000e+00 : f32
    %386 = vector.broadcast %cst_122 : f32 to vector<2x32xf32>
    %387 = arith.addf %386, %385 : vector<2x32xf32>
    %388 = arith.divf %386, %387 : vector<2x32xf32>
    %389 = vector.extract_strided_slice %364 {offsets = [0, 96], sizes = [2, 32], strides = [1, 1]} : vector<2x128xf32> to vector<2x32xf32>
    %390 = arith.negf %389 : vector<2x32xf32>
    %391 = math.exp %390 : vector<2x32xf32>
    %cst_123 = arith.constant 1.000000e+00 : f32
    %392 = vector.broadcast %cst_123 : f32 to vector<2x32xf32>
    %393 = arith.addf %392, %391 : vector<2x32xf32>
    %394 = arith.divf %392, %393 : vector<2x32xf32>
    %395 = arith.mulf %376, %370 : vector<2x32xf32>
    %396 = arith.mulf %382, %394 : vector<2x32xf32>
    %397 = arith.addf %395, %396 : vector<2x32xf32>
    %398 = math.tanh %397 : vector<2x32xf32>
    %399 = arith.mulf %388, %398 : vector<2x32xf32>
    %c0_124 = arith.constant 0 : index
    %c0_125 = arith.constant 0 : index
    %400 = vector.load %arg5[%c0_124, %c0_125] : memref<2x64xf32, #tpu.memory_space<vmem>>, vector<2x32xf32>
    tpu.vector_store %arg5[%c0_124, %c0_125], %399 {strides = array<i32>} : memref<2x64xf32, #tpu.memory_space<vmem>>, vector<2x32xf32>,
    %c0_126 = arith.constant 0 : index
    %c32_127 = arith.constant 32 : index
    %401 = vector.load %arg5[%c0_126, %c32_127] : memref<2x64xf32, #tpu.memory_space<vmem>>, vector<2x32xf32>
    tpu.vector_store %arg5[%c0_126, %c32_127], %397 {strides = array<i32>} : memref<2x64xf32, #tpu.memory_space<vmem>>, vector<2x32xf32>,
    %c0_128 = arith.constant 0 : index
    %c7_129 = arith.constant 7 : index
    %c0_130 = arith.constant 0 : index
    %402 = vector.load %arg4[%c0_128, %c7_129, %c0_130] : memref<2x8x32xf32, #tpu.memory_space<vmem>>, vector<2x1x32xf32>
    %403 = vector.shape_cast %402 : vector<2x1x32xf32> to vector<2x32xf32>
    %404 = vector.shape_cast %399 : vector<2x32xf32> to vector<2x1x32xf32>
    tpu.vector_store %arg4[%c0_128, %c7_129, %c0_130], %404 {strides = array<i32>} : memref<2x8x32xf32, #tpu.memory_space<vmem>>, vector<2x1x32xf32>,
    return
  }
  func.func @transform_0(%arg0: i32) -> (i32, i32, i32) {
    %c0_i32 = arith.constant 0 : i32
    %c0_i32_0 = arith.constant 0 : i32
    %c0_i32_1 = arith.constant 0 : i32
    return %c0_i32, %arg0, %c0_i32_0 : i32, i32, i32
  }
  func.func @transform_1(%arg0: i32) -> (i32, i32) {
    %c0_i32 = arith.constant 0 : i32
    %c0_i32_0 = arith.constant 0 : i32
    %c0_i32_1 = arith.constant 0 : i32
    return %c0_i32, %c0_i32_0 : i32, i32
  }
  func.func @transform_2(%arg0: i32) -> (i32, i32) {
    %c0_i32 = arith.constant 0 : i32
    %c0_i32_0 = arith.constant 0 : i32
    %c0_i32_1 = arith.constant 0 : i32
    return %c0_i32, %c0_i32_0 : i32, i32
  }
  func.func @transform_3(%arg0: i32) -> (i32, i32, i32) {
    %c0_i32 = arith.constant 0 : i32
    %c0_i32_0 = arith.constant 0 : i32
    %c0_i32_1 = arith.constant 0 : i32
    return %c0_i32, %arg0, %c0_i32_0 : i32, i32, i32
  }
}

</mosaic_0001>

<bundles_post_ra>
// kernel: time_lstm_forward.1
= control target key start
LH: loop header
LB: loop body
LE: loop exit
PB: predicated region body
PF: predicated region fallthrough
CT: control target
= control target key end

     0   :  { %vm19_vm0 = vcmask 517120   ;;  %v1745_v4 = vmov 0.0   ;;  %s2291_s0 = inlined_call_operand.vmem [shape: f32[2,8,160], index: 0, kind: input, shape index: {}]   ;;  %s2292_s1 = inlined_call_operand.vmem [shape: f32[64,160], index: 1, kind: input, shape index: {}]   ;;  %s2293_s2 = inlined_call_operand.vmem [shape: f32[1,160], index: 2, kind: input, shape index: {}]   ;;  %s2294_s3 = inlined_call_operand.hbm [shape: f32[2,8,32], index: 3, kind: output, shape index: {}]  }
   0x1   :  { %v1776_v0 = vld [vmem:[%s2292_s1 + $0x78] sm:$0xff]  ;;  %v1781_v1 = vld [vmem:[%s2292_s1 + $0x70] sm:$0xff]  ;;  %v1786_v2 = vld [vmem:[%s2292_s1 + $0x68] sm:$0xff]  ;;  %20 = vst.msk [vmem:[#allocation2] sm:$0x3] %vm19_vm0, %v1745_v4  ;;  %121 = vmatprep.mubr.f32.mxu0 %v1745_v4 }
   0x2   :  { %73 = vmatprep.subr.mxu0 %v1776_v0  ;;  %v1792_v3 = vld [vmem:[%s2292_s1 + $0x60] sm:$0xff]  ;;  %v1800_v5 = vld [vmem:[%s2292_s1 + $0x58] sm:$0xff]  ;;  %270 = vmatprep.subr.mxu1 %v1776_v0  ;;  %v1807_v6 = vld [vmem:[%s2292_s1 + $0x50] sm:$0xff] }
   0x3   :  { %74 = vmatpush1.msra.mxu0 %v1781_v1  ;;  %271 = vmatpush1.msra.mxu1 %v1781_v1  ;;  %v1814_v7 = vld [vmem:[%s2292_s1 + $0x48] sm:$0xff]  ;;  %v1821_v8 = vld [vmem:[%s2292_s1 + $0x40] sm:$0xff]  ;;  %v1828_v9 = vld [vmem:[%s2292_s1 + $0x38] sm:$0xff] }
   0x4   :  { %75 = vmatprep.subr.mxu0 %v1786_v2  ;;  %272 = vmatprep.subr.mxu1 %v1786_v2 }
   0x5   :  { %76 = vmatpush1.msra.mxu0 %v1792_v3  ;;  %273 = vmatpush1.msra.mxu1 %v1792_v3 }
   0x6   :  { %77 = vmatprep.subr.mxu0 %v1800_v5  ;;  %274 = vmatprep.subr.mxu1 %v1800_v5 }
   0x7   :  { %78 = vmatpush1.msra.mxu0 %v1807_v6 }
   0x8   :  { %8 = vsyncpa [#allocation4], 0  ;;  %79 = vmatprep.subr.mxu0 %v1814_v7  ;;  %v1835_v10 = vld [vmem:[%s2292_s1 + $0x30] sm:$0xff]  ;;  %275 = vmatpush1.msra.mxu1 %v1807_v6  ;;  %v1842_v11 = vld [vmem:[%s2292_s1 + $0x28] sm:$0xff]  ;;  %vm53_vm1 = vcmask 523264   ;;  %v43_v18 = vlaneseq  ;;  %s1748_s22 = smov 64  }
   0x9   :  { %80 = vmatpush1.msra.mxu0 %v1821_v8  ;;  %276 = vmatprep.subr.mxu1 %v1814_v7  ;;  %v1849_v12 = vld [vmem:[%s2292_s1 + $0x20] sm:$0xff]  ;;  %v1856_v13 = vld [vmem:[%s2292_s1 + $0x18] sm:$0xff]  ;;  %v1863_v14 = vld [vmem:[%s2292_s1 + $0x10] sm:$0xff]  ;;  %v1746_v19 = vmov 1966171168   ;;  %s1749_s23 = smov 96  }
   0xa   :  { %81 = vmatprep.subr.mxu0 %v1828_v9  ;;  %277 = vmatpush1.msra.mxu1 %v1821_v8  ;;  %v1870_v15 = vld [vmem:[%s2292_s1 + $0x8] sm:$0xff]  ;;  %v1877_v16 = vld [vmem:[%s2292_s1] sm:$0xff]  ;;  %v132_v20 = vunpack.c.l.s4 %v1746_v19  ;;  %v44_v21 = vshrl.u32 %v43_v18, 7  ;;  %v1620_v24 = vld [vmem:[%s2291_s0 + $0x10] ss:$8 sm:$0x3] }
   0xb   :  { %82 = vmatpush1.msra.mxu0 %v1835_v10  ;;  %278 = vmatprep.subr.mxu1 %v1828_v9  ;;  %v1881_v17 = vld [vmem:[#allocation2] sm:$0x3]  ;;  %vm199_vm2 = vcmask 254976   ;;  %vm205_vm3 = vcmask 517376   ;;  %vm243_vm4 = vcmask 253952  }
   0xc   :  { %83 = vmatprep.subr.mxu0 %v1842_v11  ;;  %279 = vmatpush1.msra.mxu1 %v1835_v10  ;;  %v133_v22 = vunpack.c.0.s8 %v132_v20  ;;  %v39_v23 = vld [vmem:[%s2291_s0] ss:$8 sm:$0x3]  ;;  %v1919_v27 = vsub.s32 0, %v44_v21  ;;  %v49_v30 = vsub.s32 1, %v44_v21 }
   0xd   :  { %84 = vmatpush1.msra.mxu0 %v1849_v12  ;;  %280 = vmatprep.subr.mxu1 %v1842_v11  ;;  %v130_v25 = vcombine.low %v39_v23, %v1620_v24  ;;  %v37_v28 = vld [vmem:[%s2293_s2] sm:$0x3]  ;;  %s1747_s2 = smov 32  }
   0xe   :  { %85 = vmatprep.subr.mxu0 %v1856_v13  ;;  %281 = vmatpush1.msra.mxu1 %v1849_v12  ;;  %v1917_v26 = vsub.s32 %v133_v22, %v44_v21  ;;  %v1926_v31 = vrot.slane %v37_v28, %v1919_v27  ;;  %v1929_v33 = vrot.slane %v37_v28, %v49_v30  ;;  %v1623_v63 = vld [vmem:[%s2291_s0 + $0x1] ss:$8 sm:$0x3] }
   0xf   :  { %86 = vmatpush1.msra.mxu0 %v1863_v14  ;;  %282 = vmatprep.subr.mxu1 %v1856_v13 }
  0x10   :  { %87 = vmatprep.subr.mxu0 %v1870_v15  ;;  %283 = vmatpush1.msra.mxu1 %v1863_v14  ;;  %v137_v29 = vrot.slane %v130_v25, %v1917_v26 }
  0x11   :  { %88 = vmatpush1.msra.mxu0 %v1877_v16  ;;  %284 = vmatprep.subr.mxu1 %v1870_v15 }
  0x12   :  { %1621 = vmatmul.mubr.msk.f32.vlgmr.msra.gmra.mxu0 %vm53_vm1, %v1881_v17  ;;  %285 = vmatpush1.msra.mxu1 %v1877_v16  ;;  %v144_v32 = vrot.slane %v137_v29, %v1917_v26  ;;  %v153_v40 = vcombine.high %v137_v29, %v137_v29 }
  0x13   :  { %318 = vmatprep.mubr.f32.mxu1 %v1745_v4  ;;  %464 = vmatprep.subr.mxu0 %v1776_v0 }
  0x14   :  { %465 = vmatpush1.msra.mxu0 %v1781_v1  ;;  %512 = vmatprep.mubr.f32.mxu0 %v1745_v4  ;;  %v160_v41 = vrot.slane %v153_v40, %v1917_v26 }
  0x15   :  { %466 = vmatprep.subr.mxu0 %v1786_v2  ;;  %658 = vmatprep.subr.mxu1 %v1776_v0 }
  0x16   :  { %467 = vmatpush1.msra.mxu0 %v1792_v3 }
  0x17   :  { %468 = vmatprep.subr.mxu0 %v1800_v5 }
  0x18   :  { %469 = vmatpush1.msra.mxu0 %v1807_v6 }
  0x19   :  { %470 = vmatprep.subr.mxu0 %v1814_v7 }
  0x1a   :  { %471 = vmatpush1.msra.mxu0 %v1821_v8 }
  0x1b   :  { %472 = vmatprep.subr.mxu0 %v1828_v9 }
  0x1c   :  { %473 = vmatpush1.msra.mxu0 %v1835_v10 }
  0x1d   :  { %474 = vmatprep.subr.mxu0 %v1842_v11 }
  0x1e   :  { %475 = vmatpush1.msra.mxu0 %v1849_v12 }
  0x1f   :  { %476 = vmatprep.subr.mxu0 %v1856_v13 }
  0x20   :  { %477 = vmatpush1.msra.mxu0 %v1863_v14 }
  0x21   :  { %478 = vmatprep.subr.mxu0 %v1870_v15 }
  0x22   :  { %479 = vmatpush1.msra.mxu0 %v1877_v16 }
  0x23   :  { %852 = vmatprep.subr.mxu0 %v1776_v0 }
  0xd2   :  { %v123_v34 = vpop.f32.mrf.mxu0 }
  0xd3   :  { %v124_v35 = vadd.f32 %v123_v34, %v1926_v31 }
  0xd4   :  { %v125_v36 = vpop.f32.mrf.mxu0 }
  0xd5   :  { %v146_v37 = vadd.f32 %v144_v32, %v124_v35  ;;  %v126_v38 = vadd.f32 %v125_v36, %v1929_v33 }
  0xd7   :  { %v1622_v39 = vmul.f32 -1.442695, %v146_v37  ;;  %1659 = vtanh.f32 %v126_v38 }
  0xd9   :  { %1661 = vpow2.f32 %v1622_v39 }
  0xe4   :  { %v1660_v42 = vpop.eup %1659 }
  0xe5   :  { %149 = vrot.lane.b32.xlu0 %v1660_v42, %s1747_s2  ;;  %v162_v45 = vmul.f32 %v1660_v42, %v160_v41 }
  0xe6   :  { %v1662_v43 = vpop.eup %1661 }
  0xe7   :  { %v171_v44 = vadd.f32 1.0, %v1662_v43 }
  0xe9   :  { %1663 = vrcp.f32 %v171_v44  ;;  %164 = vrot.lane.b32.xlu0 %v162_v45, %s1747_s2 }
  0xf6   :  { %v1664_v46 = vpop.eup %1663 }
  0xf7   :  { %180 = vrot.lane.b32.xlu1 %v1664_v46, %s1748_s22 }
 0x157   :  { %v150_v47 = vpop.permute.xlu0 %149 }
 0x158   :  { %v152_v48 = vsub.f32 %v1881_v17, %v150_v47  ;;  %v1624_v17 = vld [vmem:[%s2291_s0 + $0x11] ss:$8 sm:$0x3] }
 0x159   :  { %v327_v18 = vcombine.low %v1623_v63, %v1624_v17 }
 0x15b   :  { %v165_v49 = vpop.permute.xlu0 %164  ;;  %v334_v19 = vrot.slane %v327_v18, %v1917_v26 }
 0x15c   :  { %v167_v50 = vadd.f32 %v165_v49, %v152_v48 }
 0x15d   :  { %v341_v20 = vrot.slane %v334_v19, %v1917_v26  ;;  %v350_v29 = vcombine.high %v334_v19, %v334_v19 }
 0x15e   :  { %175 = vrot.lane.b32.xlu1 %v167_v50, %s1749_s23 }
 0x15f   :  { %v357_v30 = vrot.slane %v350_v29, %v1917_v26 }
 0x169   :  { %v181_v51 = vpop.permute.xlu1 %180 }
 0x16a   :  { %v183_v52 = vmul.f32 %v1664_v46, %v181_v51 }
 0x16c   :  { %185 = vrot.lane.b32.xlu0 %v183_v52, %s1749_s23 }
 0x1d0   :  { %v176_v53 = vpop.permute.xlu1 %175 }
 0x1d1   :  { %v178_v54 = vmul.f32 %v1664_v46, %v176_v53 }
 0x1de   :  { %v186_v55 = vpop.permute.xlu0 %185 }
 0x1df   :  { %v188_v56 = vadd.f32 %v186_v55, %v178_v54  ;;  %v1627_v54 = vld [vmem:[%s2291_s0 + $0x2] ss:$8 sm:$0x3]  ;;  %v1628_v55 = vld [vmem:[%s2291_s0 + $0x12] ss:$8 sm:$0x3] }
 0x1e1   :  { %1665 = vtanh.f32 %v188_v56 }
 0x1ee   :  { %v1666_v57 = vpop.eup %1665 }
 0x1ef   :  { %191 = vrot.lane.b32.xlu1 %v1666_v57, %s1748_s22 }
 0x1f3   :  { %202 = vrot.lane.b32.xlu1 %v188_v56, %s1747_s2  ;;  %v521_v56 = vcombine.low %v1627_v54, %v1628_v55 }
 0x1f5   :  { %v528_v57 = vrot.slane %v521_v56, %v1917_v26 }
 0x1f7   :  { %v544_v19 = vcombine.high %v528_v57, %v528_v57 }
 0x261   :  { %v192_v58 = vpop.permute.xlu1 %191 }
 0x262   :  { %v1942_v59 = vmul.f32 %v1664_v46, %v192_v58  ;;  %v535_v58 = vrot.slane %v528_v57, %v1917_v26 }
 0x264   :  { %196 = vrot.lane.b32.xlu0 %v1942_v59, %s1748_s22 }
 0x265   :  { %v203_v61 = vpop.permute.xlu1 %202 }
 0x2d6   :  { %v197_v60 = vpop.permute.xlu0 %196 }
 0x2d7   :  { %200 = vst.msk [vmem:[#allocation2] sm:$0x3] %vm199_vm2, %v197_v60 }
 0x2d8   :  { %206 = vst.msk [vmem:[#allocation2] sm:$0x3] %vm205_vm3, %v203_v61 }
 0x2df   :  { %v246_v62 = vld [vmem:[#allocation2] sm:$0x3] }
 0x2e0   :  { %1625 = vmatmul.mubr.msk.f32.vlgmr.msra.gmra.mxu1 %vm53_vm1, %v246_v62 }
 0x2e1   :  { %659 = vmatpush1.msra.mxu1 %v1781_v1  ;;  %706 = vmatprep.mubr.f32.mxu1 %v1745_v4 }
 0x2e2   :  { %660 = vmatprep.subr.mxu1 %v1786_v2 }
 0x2e3   :  { %661 = vmatpush1.msra.mxu1 %v1792_v3 }
 0x2e4   :  { %662 = vmatprep.subr.mxu1 %v1800_v5 }
 0x2e5   :  { %663 = vmatpush1.msra.mxu1 %v1807_v6 }
 0x2e6   :  { %664 = vmatprep.subr.mxu1 %v1814_v7 }
 0x2e7   :  { %665 = vmatpush1.msra.mxu1 %v1821_v8 }
 0x2e8   :  { %666 = vmatprep.subr.mxu1 %v1828_v9 }
 0x2e9   :  { %667 = vmatpush1.msra.mxu1 %v1835_v10 }
 0x2ea   :  { %668 = vmatprep.subr.mxu1 %v1842_v11 }
 0x2eb   :  { %669 = vmatpush1.msra.mxu1 %v1849_v12 }
 0x2ec   :  { %670 = vmatprep.subr.mxu1 %v1856_v13 }
 0x2ed   :  { %671 = vmatpush1.msra.mxu1 %v1863_v14 }
 0x2ee   :  { %672 = vmatprep.subr.mxu1 %v1870_v15 }
 0x2ef   :  { %673 = vmatpush1.msra.mxu1 %v1877_v16 }
 0x2f0   :  { %1046 = vmatprep.subr.mxu1 %v1776_v0 }
 0x3a0   :  { %v320_v21 = vpop.f32.mrf.mxu1 }
 0x3a1   :  { %v321_v22 = vadd.f32 %v320_v21, %v1926_v31 }
 0x3a2   :  { %v322_v23 = vpop.f32.mrf.mxu1 }
 0x3a3   :  { %v343_v24 = vadd.f32 %v341_v20, %v321_v22  ;;  %v323_v25 = vadd.f32 %v322_v23, %v1929_v33  ;;  %v551_v20 = vrot.slane %v544_v19, %v1917_v26 }
 0x3a5   :  { %v1626_v28 = vmul.f32 -1.442695, %v343_v24  ;;  %1667 = vtanh.f32 %v323_v25 }
 0x3a7   :  { %1669 = vpow2.f32 %v1626_v28 }
 0x3b2   :  { %v1668_v32 = vpop.eup %1667 }
 0x3b3   :  { %346 = vrot.lane.b32.xlu0 %v1668_v32, %s1747_s2  ;;  %v359_v34 = vmul.f32 %v1668_v32, %v357_v30 }
 0x3b4   :  { %v1670_v35 = vpop.eup %1669 }
 0x3b5   :  { %v368_v36 = vadd.f32 1.0, %v1670_v35  ;;  %361 = vrot.lane.b32.xlu1 %v359_v34, %s1747_s2 }
 0x3b7   :  { %1671 = vrcp.f32 %v368_v36 }
 0x3c4   :  { %v1672_v37 = vpop.eup %1671 }
 0x3c5   :  { %377 = vrot.lane.b32.xlu0 %v1672_v37, %s1748_s22 }
 0x425   :  { %v347_v38 = vpop.permute.xlu0 %346 }
 0x426   :  { %v349_v39 = vsub.f32 %v246_v62, %v347_v38 }
 0x427   :  { %v362_v40 = vpop.permute.xlu1 %361 }
 0x428   :  { %v364_v41 = vadd.f32 %v362_v40, %v349_v39 }
 0x42a   :  { %372 = vrot.lane.b32.xlu1 %v364_v41, %s1749_s23 }
 0x437   :  { %v378_v42 = vpop.permute.xlu0 %377 }
 0x438   :  { %v380_v43 = vmul.f32 %v1672_v37, %v378_v42 }
 0x43a   :  { %382 = vrot.lane.b32.xlu0 %v380_v43, %s1749_s23 }
 0x49c   :  { %v373_v44 = vpop.permute.xlu1 %372 }
 0x49d   :  { %v375_v45 = vmul.f32 %v1672_v37, %v373_v44 }
 0x4ac   :  { %v383_v46 = vpop.permute.xlu0 %382 }
 0x4ad   :  { %v385_v47 = vadd.f32 %v383_v46, %v375_v45  ;;  %v1631_v46 = vld [vmem:[%s2291_s0 + $0x3] ss:$8 sm:$0x3] }
 0x4af   :  { %1673 = vtanh.f32 %v385_v47 }
 0x4bc   :  { %v1674_v48 = vpop.eup %1673 }
 0x4bd   :  { %388 = vrot.lane.b32.xlu1 %v1674_v48, %s1748_s22 }
 0x4c1   :  { %398 = vrot.lane.b32.xlu1 %v385_v47, %s1747_s2  ;;  %v1632_v47 = vld [vmem:[%s2291_s0 + $0x13] ss:$8 sm:$0x3] }
 0x4c2   :  { %v715_v48 = vcombine.low %v1631_v46, %v1632_v47 }
 0x52f   :  { %v389_v49 = vpop.permute.xlu1 %388 }
 0x530   :  { %v1984_v50 = vmul.f32 %v1672_v37, %v389_v49  ;;  %v722_v49 = vrot.slane %v715_v48, %v1917_v26 }
 0x532   :  { %393 = vrot.lane.b32.xlu0 %v1984_v50, %s1748_s22  ;;  %v738_v57 = vcombine.high %v722_v49, %v722_v49 }
 0x533   :  { %v399_v52 = vpop.permute.xlu1 %398 }
 0x5a4   :  { %v394_v51 = vpop.permute.xlu0 %393 }
 0x5a5   :  { %396 = vst.msk [vmem:[#allocation2] sm:$0x3] %vm199_vm2, %v394_v51  ;;  %v729_v51 = vrot.slane %v722_v49, %v1917_v26 }
 0x5a6   :  { %401 = vst.msk [vmem:[#allocation2] sm:$0x3] %vm205_vm3, %v399_v52 }
 0x5ad   :  { %v440_v53 = vld [vmem:[#allocation2] sm:$0x3] }
 0x5ae   :  { %1629 = vmatmul.mubr.msk.f32.vlgmr.msra.gmra.mxu0 %vm53_vm1, %v440_v53 }
 0x5af   :  { %853 = vmatpush1.msra.mxu0 %v1781_v1  ;;  %900 = vmatprep.mubr.f32.mxu0 %v1745_v4 }
 0x5b0   :  { %854 = vmatprep.subr.mxu0 %v1786_v2 }
 0x5b1   :  { %855 = vmatpush1.msra.mxu0 %v1792_v3 }
 0x5b2   :  { %856 = vmatprep.subr.mxu0 %v1800_v5 }
 0x5b3   :  { %857 = vmatpush1.msra.mxu0 %v1807_v6 }
 0x5b4   :  { %858 = vmatprep.subr.mxu0 %v1814_v7 }
 0x5b5   :  { %859 = vmatpush1.msra.mxu0 %v1821_v8 }
 0x5b6   :  { %860 = vmatprep.subr.mxu0 %v1828_v9 }
 0x5b7   :  { %861 = vmatpush1.msra.mxu0 %v1835_v10 }
 0x5b8   :  { %862 = vmatprep.subr.mxu0 %v1842_v11 }
 0x5b9   :  { %863 = vmatpush1.msra.mxu0 %v1849_v12 }
 0x5ba   :  { %864 = vmatprep.subr.mxu0 %v1856_v13 }
 0x5bb   :  { %865 = vmatpush1.msra.mxu0 %v1863_v14 }
 0x5bc   :  { %866 = vmatprep.subr.mxu0 %v1870_v15 }
 0x5bd   :  { %867 = vmatpush1.msra.mxu0 %v1877_v16 }
 0x5be   :  { %1240 = vmatprep.subr.mxu0 %v1776_v0 }
 0x66e   :  { %v514_v60 = vpop.f32.mrf.mxu0 }
 0x66f   :  { %v515_v61 = vadd.f32 %v514_v60, %v1926_v31 }
 0x670   :  { %v516_v62 = vpop.f32.mrf.mxu0 }
 0x671   :  { %v537_v63 = vadd.f32 %v535_v58, %v515_v61  ;;  %v517_v17 = vadd.f32 %v516_v62, %v1929_v33  ;;  %v745_v58 = vrot.slane %v738_v57, %v1917_v26 }
 0x673   :  { %v1630_v18 = vmul.f32 -1.442695, %v537_v63  ;;  %1675 = vtanh.f32 %v517_v17 }
 0x675   :  { %1677 = vpow2.f32 %v1630_v18 }
 0x680   :  { %v1676_v21 = vpop.eup %1675 }
 0x681   :  { %540 = vrot.lane.b32.xlu0 %v1676_v21, %s1747_s2  ;;  %v553_v22 = vmul.f32 %v1676_v21, %v551_v20 }
 0x682   :  { %v1678_v23 = vpop.eup %1677 }
 0x683   :  { %v562_v24 = vadd.f32 1.0, %v1678_v23  ;;  %555 = vrot.lane.b32.xlu1 %v553_v22, %s1747_s2 }
 0x685   :  { %1679 = vrcp.f32 %v562_v24 }
 0x692   :  { %v1680_v25 = vpop.eup %1679 }
 0x693   :  { %571 = vrot.lane.b32.xlu0 %v1680_v25, %s1748_s22 }
 0x6f3   :  { %v541_v28 = vpop.permute.xlu0 %540 }
 0x6f4   :  { %v543_v29 = vsub.f32 %v440_v53, %v541_v28 }
 0x6f5   :  { %v556_v30 = vpop.permute.xlu1 %555 }
 0x6f6   :  { %v558_v32 = vadd.f32 %v556_v30, %v543_v29 }
 0x6f8   :  { %566 = vrot.lane.b32.xlu1 %v558_v32, %s1749_s23 }
 0x705   :  { %v572_v34 = vpop.permute.xlu0 %571 }
 0x706   :  { %v574_v35 = vmul.f32 %v1680_v25, %v572_v34 }
 0x708   :  { %576 = vrot.lane.b32.xlu0 %v574_v35, %s1749_s23 }
 0x76a   :  { %v567_v36 = vpop.permute.xlu1 %566 }
 0x76b   :  { %v569_v37 = vmul.f32 %v1680_v25, %v567_v36 }
 0x77a   :  { %v577_v38 = vpop.permute.xlu0 %576 }
 0x77b   :  { %v579_v39 = vadd.f32 %v577_v38, %v569_v37  ;;  %v1635_v38 = vld [vmem:[%s2291_s0 + $0x4] ss:$8 sm:$0x3] }
 0x77d   :  { %1681 = vtanh.f32 %v579_v39 }
 0x78a   :  { %v1682_v40 = vpop.eup %1681 }
 0x78b   :  { %582 = vrot.lane.b32.xlu1 %v1682_v40, %s1748_s22 }
 0x78f   :  { %592 = vrot.lane.b32.xlu1 %v579_v39, %s1747_s2  ;;  %v1636_v39 = vld [vmem:[%s2291_s0 + $0x14] ss:$8 sm:$0x3] }
 0x790   :  { %v909_v40 = vcombine.low %v1635_v38, %v1636_v39 }
 0x7fd   :  { %v583_v41 = vpop.permute.xlu1 %582 }
 0x7fe   :  { %v2026_v42 = vmul.f32 %v1680_v25, %v583_v41  ;;  %v916_v41 = vrot.slane %v909_v40, %v1917_v26 }
 0x800   :  { %587 = vrot.lane.b32.xlu0 %v2026_v42, %s1748_s22 }
 0x801   :  { %v593_v44 = vpop.permute.xlu1 %592 }
 0x872   :  { %v588_v43 = vpop.permute.xlu0 %587 }
 0x873   :  { %590 = vst.msk [vmem:[#allocation2] sm:$0x3] %vm199_vm2, %v588_v43  ;;  %v923_v43 = vrot.slane %v916_v41, %v1917_v26 }
 0x874   :  { %595 = vst.msk [vmem:[#allocation2] sm:$0x3] %vm205_vm3, %v593_v44 }
 0x87b   :  { %v634_v45 = vld [vmem:[#allocation2] sm:$0x3] }
 0x87c   :  { %1633 = vmatmul.mubr.msk.f32.vlgmr.msra.gmra.mxu1 %vm53_vm1, %v634_v45 }
 0x87d   :  { %1047 = vmatpush1.msra.mxu1 %v1781_v1  ;;  %1094 = vmatprep.mubr.f32.mxu1 %v1745_v4 }
 0x87e   :  { %1048 = vmatprep.subr.mxu1 %v1786_v2 }
 0x87f   :  { %1049 = vmatpush1.msra.mxu1 %v1792_v3 }
 0x880   :  { %1050 = vmatprep.subr.mxu1 %v1800_v5 }
 0x881   :  { %1051 = vmatpush1.msra.mxu1 %v1807_v6 }
 0x882   :  { %1052 = vmatprep.subr.mxu1 %v1814_v7 }
 0x883   :  { %1053 = vmatpush1.msra.mxu1 %v1821_v8 }
 0x884   :  { %1054 = vmatprep.subr.mxu1 %v1828_v9 }
 0x885   :  { %1055 = vmatpush1.msra.mxu1 %v1835_v10 }
 0x886   :  { %1056 = vmatprep.subr.mxu1 %v1842_v11 }
 0x887   :  { %1057 = vmatpush1.msra.mxu1 %v1849_v12 }
 0x888   :  { %1058 = vmatprep.subr.mxu1 %v1856_v13 }
 0x889   :  { %1059 = vmatpush1.msra.mxu1 %v1863_v14 }
 0x88a   :  { %1060 = vmatprep.subr.mxu1 %v1870_v15 }
 0x88b   :  { %1061 = vmatpush1.msra.mxu1 %v1877_v16 }
 0x88c   :  { %1434 = vmatprep.subr.mxu1 %v1776_v0 }
 0x93c   :  { %v708_v52 = vpop.f32.mrf.mxu1 }
 0x93d   :  { %v709_v53 = vadd.f32 %v708_v52, %v1926_v31 }
 0x93e   :  { %v710_v54 = vpop.f32.mrf.mxu1 }
 0x93f   :  { %v731_v55 = vadd.f32 %v729_v51, %v709_v53  ;;  %v711_v0 = vadd.f32 %v710_v54, %v1929_v33  ;;  %v932_v51 = vcombine.high %v916_v41, %v916_v41 }
 0x941   :  { %v1634_v56 = vmul.f32 -1.442695, %v731_v55  ;;  %1683 = vtanh.f32 %v711_v0  ;;  %v939_v52 = vrot.slane %v932_v51, %v1917_v26 }
 0x943   :  { %1685 = vpow2.f32 %v1634_v56 }
 0x94e   :  { %v1684_v60 = vpop.eup %1683 }
 0x94f   :  { %734 = vrot.lane.b32.xlu0 %v1684_v60, %s1747_s2  ;;  %v747_v61 = vmul.f32 %v1684_v60, %v745_v58 }
 0x950   :  { %v1686_v62 = vpop.eup %1685 }
 0x951   :  { %v756_v63 = vadd.f32 1.0, %v1686_v62  ;;  %749 = vrot.lane.b32.xlu1 %v747_v61, %s1747_s2 }
 0x953   :  { %1687 = vrcp.f32 %v756_v63 }
 0x960   :  { %v1688_v17 = vpop.eup %1687 }
 0x961   :  { %765 = vrot.lane.b32.xlu0 %v1688_v17, %s1748_s22 }
 0x9c1   :  { %v735_v18 = vpop.permute.xlu0 %734 }
 0x9c2   :  { %v737_v19 = vsub.f32 %v634_v45, %v735_v18 }
 0x9c3   :  { %v750_v20 = vpop.permute.xlu1 %749 }
 0x9c4   :  { %v752_v21 = vadd.f32 %v750_v20, %v737_v19 }
 0x9c6   :  { %760 = vrot.lane.b32.xlu1 %v752_v21, %s1749_s23 }
 0x9d3   :  { %v766_v22 = vpop.permute.xlu0 %765 }
 0x9d4   :  { %v768_v23 = vmul.f32 %v1688_v17, %v766_v22 }
 0x9d6   :  { %770 = vrot.lane.b32.xlu0 %v768_v23, %s1749_s23 }
 0xa38   :  { %v761_v24 = vpop.permute.xlu1 %760 }
 0xa39   :  { %v763_v25 = vmul.f32 %v1688_v17, %v761_v24 }
 0xa48   :  { %v771_v28 = vpop.permute.xlu0 %770 }
 0xa49   :  { %v773_v29 = vadd.f32 %v771_v28, %v763_v25 }
 0xa4b   :  { %1689 = vtanh.f32 %v773_v29 }
 0xa58   :  { %v1690_v30 = vpop.eup %1689 }
 0xa59   :  { %776 = vrot.lane.b32.xlu1 %v1690_v30, %s1748_s22 }
 0xa5d   :  { %786 = vrot.lane.b32.xlu1 %v773_v29, %s1747_s2 }
 0xacb   :  { %v777_v32 = vpop.permute.xlu1 %776 }
 0xacc   :  { %v2068_v34 = vmul.f32 %v1688_v17, %v777_v32 }
 0xace   :  { %781 = vrot.lane.b32.xlu0 %v2068_v34, %s1748_s22 }
 0xacf   :  { %v787_v36 = vpop.permute.xlu1 %786 }
 0xb40   :  { %v782_v35 = vpop.permute.xlu0 %781 }
 0xb41   :  { %784 = vst.msk [vmem:[#allocation2] sm:$0x3] %vm199_vm2, %v782_v35 }
 0xb42   :  { %789 = vst.msk [vmem:[#allocation2] sm:$0x3] %vm205_vm3, %v787_v36 }
 0xb49   :  { %v828_v37 = vld [vmem:[#allocation2] sm:$0x3] }
 0xb4a   :  { %1637 = vmatmul.mubr.msk.f32.vlgmr.msra.gmra.mxu0 %vm53_vm1, %v828_v37 }
 0xb4b   :  { %1241 = vmatpush1.msra.mxu0 %v1781_v1  ;;  %1288 = vmatprep.mubr.f32.mxu0 %v1745_v4 }
 0xb4c   :  { %1242 = vmatprep.subr.mxu0 %v1786_v2 }
 0xb4d   :  { %1243 = vmatpush1.msra.mxu0 %v1792_v3 }
 0xb4e   :  { %1244 = vmatprep.subr.mxu0 %v1800_v5 }
 0xb4f   :  { %1245 = vmatpush1.msra.mxu0 %v1807_v6 }
 0xb50   :  { %1246 = vmatprep.subr.mxu0 %v1814_v7 }
 0xb51   :  { %1247 = vmatpush1.msra.mxu0 %v1821_v8 }
 0xb52   :  { %1248 = vmatprep.subr.mxu0 %v1828_v9 }
 0xb53   :  { %1249 = vmatpush1.msra.mxu0 %v1835_v10 }
 0xb54   :  { %1250 = vmatprep.subr.mxu0 %v1842_v11 }
 0xb55   :  { %1251 = vmatpush1.msra.mxu0 %v1849_v12 }
 0xb56   :  { %1252 = vmatprep.subr.mxu0 %v1856_v13 }
 0xb57   :  { %1253 = vmatpush1.msra.mxu0 %v1863_v14 }
 0xb58   :  { %1254 = vmatprep.subr.mxu0 %v1870_v15 }
 0xb59   :  { %1255 = vmatpush1.msra.mxu0 %v1877_v16 }
 0xc0a   :  { %v902_v44 = vpop.f32.mrf.mxu0 }
 0xc0b   :  { %v903_v45 = vadd.f32 %v902_v44, %v1926_v31 }
 0xc0c   :  { %v904_v46 = vpop.f32.mrf.mxu0 }
 0xc0d   :  { %v925_v47 = vadd.f32 %v923_v43, %v903_v45  ;;  %v905_v48 = vadd.f32 %v904_v46, %v1929_v33 }
 0xc0f   :  { %v1638_v49 = vmul.f32 -1.442695, %v925_v47  ;;  %1691 = vtanh.f32 %v905_v48 }
 0xc11   :  { %1693 = vpow2.f32 %v1638_v49 }
 0xc1c   :  { %v1692_v53 = vpop.eup %1691 }
 0xc1d   :  { %928 = vrot.lane.b32.xlu0 %v1692_v53, %s1747_s2  ;;  %v941_v54 = vmul.f32 %v1692_v53, %v939_v52  ;;  %v1643_v52 = vld [vmem:[%s2291_s0 + $0x6] ss:$8 sm:$0x3]  ;;  %v1644_v53 = vld [vmem:[%s2291_s0 + $0x16] ss:$8 sm:$0x3] }
 0xc1e   :  { %v1694_v55 = vpop.eup %1693 }
 0xc1f   :  { %v950_v0 = vadd.f32 1.0, %v1694_v55  ;;  %943 = vrot.lane.b32.xlu1 %v941_v54, %s1747_s2  ;;  %v1297_v54 = vcombine.low %v1643_v52, %v1644_v53  ;;  %v213_v52 = vrot.slane %v1942_v59, %v1917_v26 }
 0xc21   :  { %1695 = vrcp.f32 %v950_v0  ;;  %v1304_v55 = vrot.slane %v1297_v54, %v1917_v26  ;;  %v221_v54 = vrot.slane %v213_v52, %v1917_v26 }
 0xc23   :  { %v1311_v0 = vrot.slane %v1304_v55, %v1917_v26 }
 0xc2e   :  { %v1696_v56 = vpop.eup %1695 }
 0xc2f   :  { %959 = vrot.lane.b32.xlu0 %v1696_v56, %s1748_s22 }
 0xc8f   :  { %v929_v57 = vpop.permute.xlu0 %928 }
 0xc90   :  { %v931_v58 = vsub.f32 %v828_v37, %v929_v57 }
 0xc91   :  { %v944_v60 = vpop.permute.xlu1 %943 }
 0xc92   :  { %v946_v61 = vadd.f32 %v944_v60, %v931_v58 }
 0xc94   :  { %954 = vrot.lane.b32.xlu1 %v946_v61, %s1749_s23 }
 0xca1   :  { %v960_v62 = vpop.permute.xlu0 %959 }
 0xca2   :  { %v962_v63 = vmul.f32 %v1696_v56, %v960_v62 }
 0xca4   :  { %964 = vrot.lane.b32.xlu0 %v962_v63, %s1749_s23  ;;  %v1320_v63 = vcombine.high %v1304_v55, %v1304_v55  ;;  %v408_v55 = vrot.slane %v1984_v50, %v1917_v26 }
 0xd06   :  { %v955_v17 = vpop.permute.xlu1 %954 }
 0xd07   :  { %v957_v18 = vmul.f32 %v1696_v56, %v955_v17  ;;  %v1327_v17 = vrot.slane %v1320_v63, %v1917_v26 }
 0xd16   :  { %v965_v19 = vpop.permute.xlu0 %964 }
 0xd17   :  { %v967_v20 = vadd.f32 %v965_v19, %v957_v18 }
 0xd19   :  { %1697 = vtanh.f32 %v967_v20 }
 0xd26   :  { %v1698_v21 = vpop.eup %1697 }
 0xd27   :  { %970 = vrot.lane.b32.xlu1 %v1698_v21, %s1748_s22 }
 0xd2b   :  { %980 = vrot.lane.b32.xlu1 %v967_v20, %s1747_s2 }
 0xd99   :  { %v971_v22 = vpop.permute.xlu1 %970 }
 0xd9a   :  { %v2109_v23 = vmul.f32 %v1696_v56, %v971_v22 }
 0xd9c   :  { %975 = vrot.lane.b32.xlu0 %v2109_v23, %s1748_s22 }
 0xd9d   :  { %v981_v25 = vpop.permute.xlu1 %980 }
 0xe0e   :  { %v976_v24 = vpop.permute.xlu0 %975 }
 0xe0f   :  { %978 = vst.msk [vmem:[#allocation2] sm:$0x3] %vm199_vm2, %v976_v24 }
 0xe10   :  { %983 = vst.msk [vmem:[#allocation2] sm:$0x3] %vm205_vm3, %v981_v25 }
 0xe17   :  { %v1022_v28 = vld [vmem:[#allocation2] sm:$0x3] }
 0xe18   :  { %1641 = vmatmul.mubr.msk.f32.vlgmr.msra.gmra.mxu1 %vm53_vm1, %v1022_v28 }
 0xe19   :  { %1435 = vmatpush1.msra.mxu1 %v1781_v1  ;;  %1482 = vmatprep.mubr.f32.mxu1 %v1745_v4  ;;  %v1639_v1 = vld [vmem:[%s2291_s0 + $0x5] ss:$8 sm:$0x3] }
 0xe1a   :  { %1436 = vmatprep.subr.mxu1 %v1786_v2  ;;  %v1640_v2 = vld [vmem:[%s2291_s0 + $0x15] ss:$8 sm:$0x3] }
 0xe1b   :  { %1437 = vmatpush1.msra.mxu1 %v1792_v3  ;;  %v1103_v3 = vcombine.low %v1639_v1, %v1640_v2 }
 0xe1c   :  { %1438 = vmatprep.subr.mxu1 %v1800_v5 }
 0xe1d   :  { %1439 = vmatpush1.msra.mxu1 %v1807_v6  ;;  %v1110_v4 = vrot.slane %v1103_v3, %v1917_v26 }
 0xe1e   :  { %1440 = vmatprep.subr.mxu1 %v1814_v7 }
 0xe1f   :  { %1441 = vmatpush1.msra.mxu1 %v1821_v8  ;;  %v1117_v5 = vrot.slane %v1110_v4, %v1917_v26 }
 0xe20   :  { %1442 = vmatprep.subr.mxu1 %v1828_v9 }
 0xe21   :  { %1443 = vmatpush1.msra.mxu1 %v1835_v10 }
 0xe22   :  { %1444 = vmatprep.subr.mxu1 %v1842_v11 }
 0xe23   :  { %1445 = vmatpush1.msra.mxu1 %v1849_v12  ;;  %v1126_v12 = vcombine.high %v1110_v4, %v1110_v4 }
 0xe24   :  { %1446 = vmatprep.subr.mxu1 %v1856_v13 }
 0xe25   :  { %1447 = vmatpush1.msra.mxu1 %v1863_v14  ;;  %v1133_v13 = vrot.slane %v1126_v12, %v1917_v26 }
 0xe26   :  { %1448 = vmatprep.subr.mxu1 %v1870_v15 }
 0xe27   :  { %1449 = vmatpush1.msra.mxu1 %v1877_v16 }
 0xed8   :  { %v1096_v6 = vpop.f32.mrf.mxu1 }
 0xed9   :  { %v1097_v7 = vadd.f32 %v1096_v6, %v1926_v31 }
 0xeda   :  { %v1098_v8 = vpop.f32.mrf.mxu1 }
 0xedb   :  { %v1119_v9 = vadd.f32 %v1117_v5, %v1097_v7  ;;  %v1099_v10 = vadd.f32 %v1098_v8, %v1929_v33 }
 0xedd   :  { %v1642_v11 = vmul.f32 -1.442695, %v1119_v9  ;;  %1699 = vtanh.f32 %v1099_v10 }
 0xedf   :  { %1701 = vpow2.f32 %v1642_v11 }
 0xeea   :  { %v1700_v14 = vpop.eup %1699 }
 0xeeb   :  { %1122 = vrot.lane.b32.xlu0 %v1700_v14, %s1747_s2  ;;  %v1135_v15 = vmul.f32 %v1700_v14, %v1133_v13  ;;  %v1647_v14 = vld [vmem:[%s2291_s0 + $0x7] ss:$8 sm:$0x3] }
 0xeec   :  { %v1702_v16 = vpop.eup %1701 }
 0xeed   :  { %v1144_v29 = vadd.f32 1.0, %v1702_v16  ;;  %1137 = vrot.lane.b32.xlu1 %v1135_v15, %s1747_s2  ;;  %v1648_v15 = vld [vmem:[%s2291_s0 + $0x17] ss:$8 sm:$0x3]  ;;  %s1750_s0 = smov [#allocation3]  }
 0xeee   :  { %v1491_v16 = vcombine.low %v1647_v14, %v1648_v15 }
 0xeef   :  { %1703 = vrcp.f32 %v1144_v29 }
 0xef0   :  { %v1498_v29 = vrot.slane %v1491_v16, %v1917_v26 }
 0xefc   :  { %v1704_v30 = vpop.eup %1703 }
 0xefd   :  { %1153 = vrot.lane.b32.xlu0 %v1704_v30, %s1748_s22 }
 0xf5d   :  { %v1123_v32 = vpop.permute.xlu0 %1122 }
 0xf5e   :  { %v1125_v35 = vsub.f32 %v1022_v28, %v1123_v32 }
 0xf5f   :  { %v1138_v36 = vpop.permute.xlu1 %1137 }
 0xf60   :  { %v1140_v37 = vadd.f32 %v1138_v36, %v1125_v35 }
 0xf62   :  { %1148 = vrot.lane.b32.xlu1 %v1140_v37, %s1749_s23 }
 0xf6f   :  { %v1154_v38 = vpop.permute.xlu0 %1153 }
 0xf70   :  { %v1156_v39 = vmul.f32 %v1704_v30, %v1154_v38 }
 0xf72   :  { %1158 = vrot.lane.b32.xlu0 %v1156_v39, %s1749_s23 }
 0xfd4   :  { %v1149_v40 = vpop.permute.xlu1 %1148 }
 0xfd5   :  { %v1151_v41 = vmul.f32 %v1704_v30, %v1149_v40  ;;  %v1514_v40 = vcombine.high %v1498_v29, %v1498_v29 }
 0xfe4   :  { %v1159_v43 = vpop.permute.xlu0 %1158 }
 0xfe5   :  { %v1161_v44 = vadd.f32 %v1159_v43, %v1151_v41  ;;  %v1521_v41 = vrot.slane %v1514_v40, %v1917_v26 }
 0xfe7   :  { %1705 = vtanh.f32 %v1161_v44 }
 0xff4   :  { %v1706_v45 = vpop.eup %1705 }
 0xff5   :  { %1164 = vrot.lane.b32.xlu1 %v1706_v45, %s1748_s22 }
 0xff9   :  { %1174 = vrot.lane.b32.xlu1 %v1161_v44, %s1747_s2 }
0x1067   :  { %v1165_v46 = vpop.permute.xlu1 %1164 }
0x1068   :  { %v2150_v47 = vmul.f32 %v1704_v30, %v1165_v46  ;;  %v1505_v30 = vrot.slane %v1498_v29, %v1917_v26 }
0x106a   :  { %1169 = vrot.lane.b32.xlu0 %v2150_v47, %s1748_s22 }
0x106b   :  { %v1175_v49 = vpop.permute.xlu1 %1174 }
0x10dc   :  { %v1170_v48 = vpop.permute.xlu0 %1169 }
0x10dd   :  { %1172 = vst.msk [vmem:[#allocation2] sm:$0x3] %vm199_vm2, %v1170_v48 }
0x10de   :  { %1177 = vst.msk [vmem:[#allocation2] sm:$0x3] %vm205_vm3, %v1175_v49 }
0x10e5   :  { %v1216_v51 = vld [vmem:[#allocation2] sm:$0x3] }
0x10e6   :  { %1645 = vmatmul.mubr.msk.f32.vlgmr.msra.gmra.mxu0 %vm53_vm1, %v1216_v51 }
0x11a6   :  { %v1290_v56 = vpop.f32.mrf.mxu0 }
0x11a7   :  { %v1291_v57 = vadd.f32 %v1290_v56, %v1926_v31  ;;  %v416_v56 = vrot.slane %v408_v55, %v1917_v26 }
0x11a8   :  { %v1292_v58 = vpop.f32.mrf.mxu0 }
0x11a9   :  { %v1313_v60 = vadd.f32 %v1311_v0, %v1291_v57  ;;  %v1293_v61 = vadd.f32 %v1292_v58, %v1929_v33  ;;  %v602_v57 = vrot.slane %v2026_v42, %v1917_v26  ;;  %v232_v58 = vrot.slane %v221_v54, %v1919_v27 }
0x11aa   :  { %v427_v50 = vrot.slane %v416_v56, %v1919_v27 }
0x11ab   :  { %v1646_v62 = vmul.f32 -1.442695, %v1313_v60  ;;  %1707 = vtanh.f32 %v1293_v61  ;;  %v610_v59 = vrot.slane %v602_v57, %v1917_v26  ;;  %v796_v60 = vrot.slane %v2068_v34, %v1917_v26 }
0x11ad   :  { %1709 = vpow2.f32 %v1646_v62  ;;  %v804_v61 = vrot.slane %v796_v60, %v1917_v26  ;;  %v990_v62 = vrot.slane %v2109_v23, %v1917_v26  ;;  %v621_v42 = vrot.slane %v610_v59, %v1919_v27 }
0x11af   :  { %v998_v63 = vrot.slane %v990_v62, %v1917_v26  ;;  %v815_v34 = vrot.slane %v804_v61, %v1919_v27  ;;  %v991_v29 = vcombine.high %v990_v62, %v990_v62 }
0x11b8   :  { %v1708_v18 = vpop.eup %1707 }
0x11b9   :  { %1316 = vrot.lane.b32.xlu0 %v1708_v18, %s1747_s2  ;;  %v1329_v19 = vmul.f32 %v1708_v18, %v1327_v17  ;;  %v1184_v17 = vrot.slane %v2150_v47, %v1917_v26 }
0x11ba   :  { %v1710_v20 = vpop.eup %1709 }
0x11bb   :  { %v1338_v21 = vadd.f32 1.0, %v1710_v20  ;;  %1331 = vrot.lane.b32.xlu1 %v1329_v19, %s1747_s2  ;;  %v1192_v18 = vrot.slane %v1184_v17, %v1917_v26  ;;  %v1009_v20 = vrot.slane %v998_v63, %v1919_v27 }
0x11bd   :  { %1711 = vrcp.f32 %v1338_v21  ;;  %v1203_v21 = vrot.slane %v1192_v18, %v1919_v27 }
0x11ca   :  { %v1712_v22 = vpop.eup %1711 }
0x11cb   :  { %1347 = vrot.lane.b32.xlu0 %v1712_v22, %s1748_s22 }
0x122b   :  { %v1317_v24 = vpop.permute.xlu0 %1316 }
0x122c   :  { %v1319_v25 = vsub.f32 %v1216_v51, %v1317_v24 }
0x122d   :  { %v1332_v28 = vpop.permute.xlu1 %1331 }
0x122e   :  { %v1334_v1 = vadd.f32 %v1332_v28, %v1319_v25 }
0x1230   :  { %1342 = vrot.lane.b32.xlu1 %v1334_v1, %s1749_s23 }
0x123d   :  { %v1348_v2 = vpop.permute.xlu0 %1347 }
0x123e   :  { %v1350_v3 = vmul.f32 %v1712_v22, %v1348_v2 }
0x1240   :  { %1352 = vrot.lane.b32.xlu0 %v1350_v3, %s1749_s23  ;;  %v214_v3 = vcombine.high %v213_v52, %v213_v52 }
0x12a2   :  { %v1343_v4 = vpop.permute.xlu1 %1342 }
0x12a3   :  { %v1345_v5 = vmul.f32 %v1712_v22, %v1343_v4 }
0x12b2   :  { %v1353_v6 = vpop.permute.xlu0 %1352 }
0x12b3   :  { %v1355_v7 = vadd.f32 %v1353_v6, %v1345_v5  ;;  %v409_v5 = vcombine.high %v408_v55, %v408_v55  ;;  %v228_v6 = vrot.slane %v214_v3, %v1917_v26 }
0x12b5   :  { %1713 = vtanh.f32 %v1355_v7 }
0x12c2   :  { %v1714_v8 = vpop.eup %1713 }
0x12c3   :  { %1358 = vrot.lane.b32.xlu1 %v1714_v8, %s1748_s22 }
0x12c7   :  { %1368 = vrot.lane.b32.xlu1 %v1355_v7, %s1747_s2 }
0x1335   :  { %v1359_v9 = vpop.permute.xlu1 %1358 }
0x1336   :  { %v1361_v10 = vmul.f32 %v1712_v22, %v1359_v9  ;;  %v603_v9 = vcombine.high %v602_v57, %v602_v57 }
0x1338   :  { %1363 = vrot.lane.b32.xlu0 %v1361_v10, %s1748_s22  ;;  %v1378_v19 = vrot.slane %v1361_v10, %v1917_v26  ;;  %v236_v10 = vrot.slane %v228_v6, %v1919_v27  ;;  %v617_v15 = vrot.slane %v603_v9, %v1917_v26 }
0x1339   :  { %v1369_v12 = vpop.permute.xlu1 %1368 }
0x133a   :  { %v1386_v23 = vrot.slane %v1378_v19, %v1917_v26 }
0x133c   :  { %v1397_v47 = vrot.slane %v1386_v23, %v1919_v27 }
0x13aa   :  { %v1364_v11 = vpop.permute.xlu0 %1363 }
0x13ab   :  { %1366 = vst.msk [vmem:[#allocation2] sm:$0x3] %vm199_vm2, %v1364_v11  ;;  %v423_v11 = vrot.slane %v409_v5, %v1917_v26 }
0x13ac   :  { %1371 = vst.msk [vmem:[#allocation2] sm:$0x3] %vm205_vm3, %v1369_v12 }
0x13ad   :  { %v431_v14 = vrot.slane %v423_v11, %v1919_v27 }
0x13b3   :  { %v1410_v13 = vld [vmem:[#allocation2] sm:$0x3] }
0x13b4   :  { %1649 = vmatmul.mubr.msk.f32.vlgmr.msra.gmra.mxu1 %vm53_vm1, %v1410_v13 }
0x1474   :  { %v1484_v32 = vpop.f32.mrf.mxu1 }
0x1475   :  { %v1485_v35 = vadd.f32 %v1484_v32, %v1926_v31 }
0x1476   :  { %v1486_v36 = vpop.f32.mrf.mxu1 }
0x1477   :  { %v1507_v37 = vadd.f32 %v1505_v30, %v1485_v35  ;;  %v1487_v38 = vadd.f32 %v1486_v36, %v1929_v33  ;;  %v625_v30 = vrot.slane %v617_v15, %v1919_v27  ;;  %v1185_v36 = vcombine.high %v1184_v17, %v1184_v17 }
0x1479   :  { %v1650_v39 = vmul.f32 -1.442695, %v1507_v37  ;;  %1715 = vtanh.f32 %v1487_v38  ;;  %v1005_v38 = vrot.slane %v991_v29, %v1917_v26 }
0x147b   :  { %1717 = vpow2.f32 %v1650_v39  ;;  %v1379_v39 = vcombine.high %v1378_v19, %v1378_v19  ;;  %v1013_v40 = vrot.slane %v1005_v38, %v1919_v27 }
0x1486   :  { %v1716_v43 = vpop.eup %1715 }
0x1487   :  { %1510 = vrot.lane.b32.xlu0 %v1716_v43, %s1747_s2  ;;  %v1523_v44 = vmul.f32 %v1716_v43, %v1521_v41  ;;  %v1199_v41 = vrot.slane %v1185_v36, %v1917_v26 }
0x1488   :  { %v1718_v45 = vpop.eup %1717 }
0x1489   :  { %v1532_v46 = vadd.f32 1.0, %v1718_v45  ;;  %1525 = vrot.lane.b32.xlu1 %v1523_v44, %s1747_s2  ;;  %v1207_v43 = vrot.slane %v1199_v41, %v1919_v27  ;;  %v1393_v44 = vrot.slane %v1379_v39, %v1917_v26 }
0x148b   :  { %1719 = vrcp.f32 %v1532_v46  ;;  %v1401_v45 = vrot.slane %v1393_v44, %v1919_v27 }
0x1498   :  { %v2192_v31 = vpop.eup %1719 }
0x1499   :  { %1541 = vrot.lane.b32.xlu0 %v2192_v31, %s1748_s22 }
0x14f9   :  { %v1511_v33 = vpop.permute.xlu0 %1510 }
0x14fa   :  { %v1513_v48 = vsub.f32 %v1410_v13, %v1511_v33  ;;  %v797_v13 = vcombine.high %v796_v60, %v796_v60 }
0x14fb   :  { %v1526_v49 = vpop.permute.xlu1 %1525 }
0x14fc   :  { %v1528_v51 = vadd.f32 %v1526_v49, %v1513_v48  ;;  %v811_v32 = vrot.slane %v797_v13, %v1917_v26 }
0x14fe   :  { %1536 = vrot.lane.b32.xlu1 %v1528_v51, %s1749_s23  ;;  %v819_v37 = vrot.slane %v811_v32, %v1919_v27 }
0x150b   :  { %v1542_v53 = vpop.permute.xlu0 %1541 }
0x150c   :  { %v1544_v0 = vmul.f32 %v2192_v31, %v1542_v53 }
0x150e   :  { %1546 = vrot.lane.b32.xlu0 %v1544_v0, %s1749_s23 }
0x1512   :  { %237 = vrot.lane.b32.xlu0 %v232_v58, %s1748_s22 }
0x1516   :  { %432 = vrot.lane.b32.xlu0 %v427_v50, %s1748_s22 }
0x151a   :  { %626 = vrot.lane.b32.xlu0 %v621_v42, %s1748_s22 }
0x151e   :  { %820 = vrot.lane.b32.xlu0 %v815_v34, %s1748_s22 }
0x1522   :  { %1014 = vrot.lane.b32.xlu0 %v1009_v20, %s1748_s22 }
0x1526   :  { %1208 = vrot.lane.b32.xlu0 %v1203_v21, %s1748_s22 }
0x152a   :  { %1402 = vrot.lane.b32.xlu0 %v1397_v47, %s1748_s22 }
0x1570   :  { %v1537_v22 = vpop.permute.xlu1 %1536 }
0x1571   :  { %v1539_v24 = vmul.f32 %v2192_v31, %v1537_v22 }
0x1580   :  { %v1547_v25 = vpop.permute.xlu0 %1546 }
0x1581   :  { %v2234_v28 = vadd.f32 %v1547_v25, %v1539_v24 }
0x1583   :  { %1721 = vtanh.f32 %v2234_v28 }
0x1584   :  { %v238_v1 = vpop.permute.xlu0 %237 }
0x1585   :  { %244 = vst.msk [vmem:[#allocation3] sm:$0x1] %vm243_vm4, %v238_v1 }
0x1588   :  { %v433_v2 = vpop.permute.xlu0 %432 }
0x1589   :  { %438 = vst.msk [vmem:[#allocation3 + $0x1] sm:$0x1] %vm243_vm4, %v433_v2 }
0x158c   :  { %v627_v4 = vpop.permute.xlu0 %626 }
0x158d   :  { %632 = vst.msk [vmem:[#allocation3 + $0x2] sm:$0x1] %vm243_vm4, %v627_v4 }
0x1590   :  { %v1722_v7 = vpop.eup %1721  ;;  %v821_v8 = vpop.permute.xlu0 %820 }
0x1591   :  { %826 = vst.msk [vmem:[#allocation3 + $0x3] sm:$0x1] %vm243_vm4, %v821_v8  ;;  %1552 = vrot.lane.b32.xlu1 %v1722_v7, %s1748_s22 }
0x1594   :  { %v1015_v12 = vpop.permute.xlu0 %1014 }
0x1595   :  { %1020 = vst.msk [vmem:[#allocation3 + $0x4] sm:$0x1] %vm243_vm4, %v1015_v12  ;;  %239 = vrot.lane.b32.xlu1 %v236_v10, %s1748_s22 }
0x1598   :  { %v1209_v16 = vpop.permute.xlu0 %1208 }
0x1599   :  { %1214 = vst.msk [vmem:[#allocation3 + $0x5] sm:$0x1] %vm243_vm4, %v1209_v16  ;;  %434 = vrot.lane.b32.xlu1 %v431_v14, %s1748_s22 }
0x159c   :  { %v1403_v35 = vpop.permute.xlu0 %1402 }
0x159d   :  { %1408 = vst.msk [vmem:[#allocation3 + $0x6] sm:$0x1] %vm243_vm4, %v1403_v35  ;;  %628 = vrot.lane.b32.xlu1 %v625_v30, %s1748_s22 }
0x15a1   :  { %822 = vrot.lane.b32.xlu1 %v819_v37, %s1748_s22 }
0x15a5   :  { %1016 = vrot.lane.b32.xlu1 %v1013_v40, %s1748_s22 }
0x15a9   :  { %1210 = vrot.lane.b32.xlu1 %v1207_v43, %s1748_s22 }
0x15ad   :  { %1404 = vrot.lane.b32.xlu1 %v1401_v45, %s1748_s22 }
0x1603   :  { %v1553_v46 = vpop.permute.xlu1 %1552 }
0x1604   :  { %v1555_v33 = vmul.f32 %v2192_v31, %v1553_v46 }
0x1606   :  { %v1572_v48 = vrot.slane %v1555_v33, %v1917_v26  ;;  %1557 = vrot.lane.b32.xlu0 %v1555_v33, %s1748_s22 }
0x1607   :  { %v240_v49 = vpop.permute.xlu1 %239 }
0x1608   :  { %v1573_v51 = vcombine.high %v1572_v48, %v1572_v48  ;;  %v1580_v52 = vrot.slane %v1572_v48, %v1917_v26  ;;  %245 = vst.msk [vmem:[#allocation3 + $0x8] sm:$0x1] %vm243_vm4, %v240_v49 }
0x160a   :  { %v1591_v53 = vrot.slane %v1580_v52, %v1919_v27  ;;  %v1587_v54 = vrot.slane %v1573_v51, %v1917_v26 }
0x160b   :  { %v435_v55 = vpop.permute.xlu1 %434 }
0x160c   :  { %439 = vst.msk [vmem:[#allocation3 + $0x9] sm:$0x1] %vm243_vm4, %v435_v55  ;;  %1596 = vrot.lane.b32.xlu1 %v1591_v53, %s1748_s22  ;;  %v1595_v31 = vrot.slane %v1587_v54, %v1919_v27 }
0x160e   :  { %1598 = vrot.lane.b32.xlu0 %v1595_v31, %s1748_s22  ;;  %s1609_s22 = sshll.u32 %s1750_s0, 4  ;;  %s1610_s22 = int_to_ptr.vmem [resolvable:$true] %s1609_s22 }
0x160f   :  { %v629_v0 = vpop.permute.xlu1 %628  ;;  %p1728_p1 = scmp.lt.s32.totalorder %s1610_s22, %s1610_s22 }
0x1610   :  { %633 = vst.msk [vmem:[#allocation3 + $0xa] sm:$0x1] %vm243_vm4, %v629_v0  ;;  %1562 = vrot.lane.b32.xlu1 %v2234_v28, %s1747_s2  ;;  %s1723_s2 = scalar_lea.vmem %s1610_s22, 256 }
0x1611   :  { %p1724_p0 = scmp.ne.s32.totalorder %s1610_s22, %s1723_s2  ;;  %p1729_p2 = scmp.lt.s32.totalorder %s1723_s2, %s1723_s2 }
0x1613   :  { %v823_v56 = vpop.permute.xlu1 %822  ;;  %p1730_p3 = por %p1729_p2, %p1728_p1 }
0x1614   :  { %827 = vst.msk [vmem:[#allocation3 + $0xb] sm:$0x1] %vm243_vm4, %v823_v56 }
0x1615   :  { %p1731_p4 = pnand %p1730_p3, %p1724_p0 }
0x1617   :  { %v1017_v57 = vpop.permute.xlu1 %1016 }
0x1618   :  { %1021 = vst.msk [vmem:[#allocation3 + $0xc] sm:$0x1] %vm243_vm4, %v1017_v57 }
0x161b   :  { %v1211_v26 = vpop.permute.xlu1 %1210 }
0x161c   :  { %1215 = vst.msk [vmem:[#allocation3 + $0xd] sm:$0x1] %vm243_vm4, %v1211_v26 }
0x161f   :  { %v1405_v58 = vpop.permute.xlu1 %1404 }
0x1620   :  { %1409 = vst.msk [vmem:[#allocation3 + $0xe] sm:$0x1] %vm243_vm4, %v1405_v58 }
0x1678   :  { %v1558_v27 = vpop.permute.xlu0 %1557 }
0x1679   :  { %1560 = vst.msk [vmem:[#allocation2] sm:$0x3] %vm199_vm2, %v1558_v27 }
0x167e   :  { %v1597_v59 = vpop.permute.xlu1 %1596 }
0x167f   :  { %1602 = vst.msk [vmem:[#allocation3 + $0x7] sm:$0x1] %vm243_vm4, %v1597_v59 }
0x1680   :  { %v1599_v60 = vpop.permute.xlu0 %1598 }
0x1681   :  { %1603 = vst.msk [vmem:[#allocation3 + $0xf] sm:$0x1] %vm243_vm4, %v1599_v60 }
0x1682   :  { %v1563_v50 = vpop.permute.xlu1 %1562 }
0x1683   :  { %1734 = shalt.err (!%p1731_p4)
}
0x1684   :  { %s1751_s23 = smov 128   ;;  %s1752_s26 = smov 8   ;;  %1565 = vst.msk [vmem:[#allocation2] sm:$0x3] %vm205_vm3, %v1563_v50 }
0x1685   :  { %1615 = dma.vmem_to_hbm [thread:$0]  %s1610_s22, 256, %s2294_s3, [#allocation4], %s1751_s23, %s1751_s23, %s1752_s26  }
0x1686   :  { %1743 = dma.done.wait [#allocation4], 256  }
0x1687   :  { %1744 = vsyncadd [#allocation4], 4294967040 }
0x1688   :  { %1619 = vsyncpa [#allocation4], 1 }

</bundles_post_ra>
